<compile_context>
chip_gen: v7x
topology: tpu7x:2x2x1
jax: 0.10.0
libtpu: 0.0.40
codegen_flags: <defaults>
</compile_context>

<pallas_src>
import functools

import jax
import jax.numpy as jnp
from jax.experimental import pallas as pl
from jax.experimental.pallas import tpu as pltpu


MXU_DTYPE = jnp.bfloat16      # MXU operand / intermediate-activation dtype.


# ----------------------------- Pallas kernels ------------------------------ #

def _conv_img_kernel(x_ref, w_ref, b_ref, *out_refs,
                     kh, kw, win, hout, wout, with_stats):
    """One image per grid step: direct conv via kh*kw lane-shifted matmuls.

    x_ref : (1, Cin, Lin)       whole (spatially pre-padded) image, flattened
                                row-major with row stride `win`;
                                Lin >= hout*win + (kh-1)*win + (kw-1).
    w_ref : (kh*kw, Cout, Cin)  weights (bf16), tap-major (t = ky*kw + kx);
                                constant index_map -> resident across the grid.
    b_ref : (Cout, 1)           bias (f32).
    o_ref : (1, Cout, hout*win) output slab (row stride win; columns
                                w in [wout, win) are don't-care filler).
    sum/sq: (1, Cout, 1)        per-image masked sum / sum-of-squares of the
                                post-ReLU output (only if with_stats).
    """
    if with_stats:
        o_ref, sum_ref, sq_ref = out_refs
    else:
        (o_ref,) = out_refs

    L = hout * win
    cout = w_ref.shape[1]
    x = x_ref[0]                                          # (Cin, Lin), bf16

    acc = jnp.zeros((cout, L), jnp.float32)
    for ky in range(kh):                                  # static, fully unrolled
        for kx in range(kw):
            off = ky * win + kx                           # static lane shift
            acc = acc + jnp.dot(w_ref[ky * kw + kx], x[:, off:off + L],
                                preferred_element_type=jnp.float32)

    y = jnp.maximum(acc + b_ref[...], 0.0)                # bias + ReLU in f32
    o_ref[0] = y.astype(o_ref.dtype)                      # one lane-dense slab store

    if with_stats:
        # Mask the filler columns (w >= wout) out of the BatchNorm statistics.
        col = jax.lax.broadcasted_iota(jnp.int32, (1, L), 1)
        mask = (col % win) < wout
        ym = jnp.where(mask, y, 0.0)
        sum_ref[0] = jnp.sum(ym, axis=-1, keepdims=True)
        sq_ref[0] = jnp.sum(ym * ym, axis=-1, keepdims=True)


def conv2d_img(x_flat, w, b, *, kh, kw, win, hout, wout, out_dtype, with_stats):
    """Direct conv on per-image flattened activations.

    x_flat : (N, Cin, Lin) bf16, row-major flattened padded images (row stride
             win) with kw-1 extra trailing lanes.
    w      : (kh*kw, Cout, Cin) bf16 weights.
    b      : (Cout,) f32 bias.
    Returns y (N, Cout, hout*win) [+ per-image (sum, sumsq) of shape
    (N, Cout, 1) if with_stats].
    """
    N, Cin, Lin = x_flat.shape
    Cout = w.shape[1]
    L = hout * win
    assert Lin >= (kh - 1) * win + (kw - 1) + L, (Lin, kh, kw, win, hout)

    kernel = functools.partial(_conv_img_kernel, kh=kh, kw=kw, win=win,
                               hout=hout, wout=wout, with_stats=with_stats)

    out_shape = [jax.ShapeDtypeStruct((N, Cout, L), out_dtype)]
    out_specs = [pl.BlockSpec((1, Cout, L), lambda n: (n, 0, 0))]
    if with_stats:
        # Per-image partial stats (grid-indexed): no resident accumulator, so
        # the grid axis can stay "parallel" (safe on v7x's two TensorCores).
        out_shape += [jax.ShapeDtypeStruct((N, Cout, 1), jnp.float32)] * 2
        out_specs += [pl.BlockSpec((1, Cout, 1), lambda n: (n, 0, 0))] * 2

    res = pl.pallas_call(
        kernel,
        out_shape=out_shape,
        grid=(N,),
        in_specs=[
            pl.BlockSpec((1, Cin, Lin), lambda n: (n, 0, 0)),
            pl.BlockSpec((kh * kw, Cout, Cin), lambda n: (0, 0, 0)),  # hoisted
            pl.BlockSpec((Cout, 1), lambda n: (0, 0)),                # hoisted
        ],
        out_specs=out_specs,
        compiler_params=pltpu.CompilerParams(
            dimension_semantics=("parallel",)),
    )(x_flat, w, b.reshape(Cout, 1))

    if with_stats:
        y, s, ss = res
        return y, s, ss
    return res[0]


def _scale_shift_kernel(y_ref, scale_ref, shift_ref, o_ref):
    y = y_ref[0].astype(jnp.float32)                      # affine in f32 (v5e)
    o_ref[0] = (y * scale_ref[...] + shift_ref[...]).astype(o_ref.dtype)


def channel_scale_shift(y, scale, shift, out_dtype):
    """Per-channel affine y*scale + shift (applies BatchNorm), one image/step."""
    N, C, L = y.shape
    return pl.pallas_call(
        _scale_shift_kernel,
        out_shape=jax.ShapeDtypeStruct((N, C, L), out_dtype),
        grid=(N,),
        in_specs=[
            pl.BlockSpec((1, C, L), lambda n: (n, 0, 0)),
            pl.BlockSpec((C, 1), lambda n: (0, 0)),
            pl.BlockSpec((C, 1), lambda n: (0, 0)),
        ],
        out_specs=pl.BlockSpec((1, C, L), lambda n: (n, 0, 0)),
        compiler_params=pltpu.CompilerParams(
            dimension_semantics=("parallel",)),
    )(y, scale.reshape(C, 1), shift.reshape(C, 1))


# ------------------------------ small helpers ------------------------------- #

def _flatten_for_conv(x_img, kw):
    """(N, C, Hp, Wp) -> (N, C, Hp*Wp + kw - 1): flattened + trailing pad lanes."""
    N, C, Hp, Wp = x_img.shape
    xf = x_img.reshape(N, C, Hp * Wp)
    return jnp.pad(xf, ((0, 0), (0, 0), (0, kw - 1)))


def _prep_weight(w_oihw):
    """(Cout, Cin, kh, kw) -> (kh*kw, Cout, Cin) bf16, tap-major (t = ky*kw+kx)."""
    Cout, Cin, kh, kw = w_oihw.shape
    return (jnp.transpose(w_oihw, (2, 3, 0, 1))
            .reshape(kh * kw, Cout, Cin).astype(MXU_DTYPE))


def _bn_scale_shift(ch_sum, ch_sumsq, count, gamma, beta, eps=1e-5):
    """Training-mode BN (biased variance) folded into a per-channel affine."""
    mean = ch_sum / count
    var = ch_sumsq / count - mean * mean
    inv_std = jax.lax.rsqrt(var + eps)
    scale = gamma * inv_std
    shift = beta - mean * scale
    return scale, shift


# ------------------------------ forward pass -------------------------------- #

def up_forward(params, x1_nchw, x2_nchw):
    """Pallas implementation of Up.forward (NCHW in / NCHW out)."""
    f32, bf16 = jnp.float32, MXU_DTYPE
    N, Cin, H, W = x1_nchw.shape
    _, Co, H2, W2 = x2_nchw.shape

    # ---- up: Upsample(2x nearest) -> Conv2d(k=2, valid) -> ReLU -> BatchNorm ----
    Hu, Wu = 2 * H, 2 * W
    Hy, Wy = Hu - 1, Wu - 1
    x1u = jnp.repeat(jnp.repeat(x1_nchw, 2, axis=2), 2, axis=3).astype(bf16)
    x1f = _flatten_for_conv(x1u, kw=2)                     # (N, Cin, Hu*Wu+1)
    y, s, ss = conv2d_img(x1f, _prep_weight(params["up_w"]), params["up_b"],
                          kh=2, kw=2, win=Wu, hout=Hy, wout=Wy,
                          out_dtype=bf16, with_stats=True)
    scale, shift = _bn_scale_shift(jnp.sum(s, 0)[:, 0], jnp.sum(ss, 0)[:, 0],
                                   float(N * Hy * Wy),
                                   params["up_gamma"], params["up_beta"])
    y = channel_scale_shift(y, scale, shift, bf16)         # (N, Co, Hy*Wu)

    # ---- F.pad to x2's spatial size, then channel concat [x2, y] ----
    y_img = y.reshape(N, Co, Hy, Wu)[..., :Wy]             # drop filler column
    diffY, diffX = H2 - Hy, W2 - Wy
    y_img = jnp.pad(y_img, ((0, 0), (0, 0),
                            (diffY // 2, diffY - diffY // 2),
                            (diffX // 2, diffX - diffX // 2)))
    x = jnp.concatenate([x2_nchw.astype(bf16), y_img], axis=1)   # (N, 2Co, H2, W2)

    # ---- Double_Conv: conv3x3(same)+ReLU -> conv3x3(same)+ReLU -> BatchNorm ----
    Wp = W2 + 2
    xp = jnp.pad(x, ((0, 0), (0, 0), (1, 1), (1, 1)))
    xf = _flatten_for_conv(xp, kw=3)
    z = conv2d_img(xf, _prep_weight(params["c1_w"]), params["c1_b"],
                   kh=3, kw=3, win=Wp, hout=H2, wout=W2,
                   out_dtype=bf16, with_stats=False)        # (N, Co, H2*Wp)

    z_img = z.reshape(N, Co, H2, Wp)[..., :W2]
    zp = jnp.pad(z_img, ((0, 0), (0, 0), (1, 1), (1, 1)))
    zf = _flatten_for_conv(zp, kw=3)
    z2, s, ss = conv2d_img(zf, _prep_weight(params["c2_w"]), params["c2_b"],
                           kh=3, kw=3, win=Wp, hout=H2, wout=W2,
                           out_dtype=f32, with_stats=True)
    scale, shift = _bn_scale_shift(jnp.sum(s, 0)[:, 0], jnp.sum(ss, 0)[:, 0],
                                   float(N * H2 * W2),
                                   params["dc_gamma"], params["dc_beta"])
    z2 = channel_scale_shift(z2, scale, shift, f32)         # (N, Co, H2*Wp)

    return z2.reshape(N, Co, H2, Wp)[..., :W2]              # NCHW (N, Co, H2, W2)


# --------------------------- pure-JAX references ---------------------------- #

def ref_forward_f32(params, x1, x2):
    """Exact f32 module semantics."""
    def conv(x, w, b, pad):
        y = jax.lax.conv_general_dilated(
            x, w, (1, 1), [(pad, pad), (pad, pad)],
            dimension_numbers=("NCHW", "OIHW", "NCHW"))
        return y + b.reshape(1, -1, 1, 1)

    def bn(x, gamma, beta, eps=1e-5):
        mean = jnp.mean(x, axis=(0, 2, 3), keepdims=True)
        var = jnp.mean((x - mean) ** 2, axis=(0, 2, 3), keepdims=True)
        return (gamma.reshape(1, -1, 1, 1) * (x - mean) * jax.lax.rsqrt(var + eps)
                + beta.reshape(1, -1, 1, 1))

    u = jnp.repeat(jnp.repeat(x1, 2, axis=2), 2, axis=3)
    y = jnp.maximum(conv(u, params["up_w"], params["up_b"], 0), 0.0)
    y = bn(y, params["up_gamma"], params["up_beta"])
    diffY = x2.shape[2] - y.shape[2]
    diffX = x2.shape[3] - y.shape[3]
    y = jnp.pad(y, ((0, 0), (0, 0),
                    (diffY // 2, diffY - diffY // 2),
                    (diffX // 2, diffX - diffX // 2)))
    x = jnp.concatenate([x2, y], axis=1)
    z = jnp.maximum(conv(x, params["c1_w"], params["c1_b"], 1), 0.0)
    z = jnp.maximum(conv(z, params["c2_w"], params["c2_b"], 1), 0.0)
    z = bn(z, params["dc_gamma"], params["dc_beta"])
    return z


def ref_forward_bf16(params, x1, x2):
    """Same math, rounding conv operands / intermediates to bf16 at the SAME
    points as the kernel (f32 accumulation, f32 BN stats) for a tight check."""
    bf16, f32 = jnp.bfloat16, jnp.float32

    def conv(x, w, b, pad):
        y = jax.lax.conv_general_dilated(
            x.astype(bf16), w.astype(bf16), (1, 1), [(pad, pad), (pad, pad)],
            dimension_numbers=("NCHW", "OIHW", "NCHW"),
            preferred_element_type=f32)
        return y + b.reshape(1, -1, 1, 1)

    def bn_apply(x_stats, x_apply, gamma, beta, eps=1e-5):
        mean = jnp.mean(x_stats, axis=(0, 2, 3), keepdims=True)
        var = jnp.mean(x_stats * x_stats, axis=(0, 2, 3), keepdims=True) - mean * mean
        scale = gamma.reshape(1, -1, 1, 1) * jax.lax.rsqrt(var + eps)
        shift = beta.reshape(1, -1, 1, 1) - mean * scale
        return x_apply * scale + shift

    u = jnp.repeat(jnp.repeat(x1, 2, axis=2), 2, axis=3)
    y = jnp.maximum(conv(u, params["up_w"], params["up_b"], 0), 0.0)     # f32
    y_b = y.astype(bf16).astype(f32)                                     # stored bf16
    y = bn_apply(y, y_b, params["up_gamma"], params["up_beta"])
    y = y.astype(bf16).astype(f32)
    diffY = x2.shape[2] - y.shape[2]
    diffX = x2.shape[3] - y.shape[3]
    y = jnp.pad(y, ((0, 0), (0, 0),
                    (diffY // 2, diffY - diffY // 2),
                    (diffX // 2, diffX - diffX // 2)))
    x = jnp.concatenate([x2, y], axis=1)
    z = jnp.maximum(conv(x, params["c1_w"], params["c1_b"], 1), 0.0)
    z = z.astype(bf16).astype(f32)
    z = jnp.maximum(conv(z, params["c2_w"], params["c2_b"], 1), 0.0)     # f32
    z = bn_apply(z, z, params["dc_gamma"], params["dc_beta"])
    return z


# --------------------------------- main ------------------------------------- #

if __name__ == "__main__":
    in_channels, out_channels = 8, 4
    N, H, W = 2, 8, 8                              # x1 spatial; x2 is 2x larger

    key = jax.random.PRNGKey(0)
    ks = jax.random.split(key, 10)
    f32 = jnp.float32

    params = {
        # up: Conv2d(in_channels, out_channels, kernel_size=2) + BatchNorm2d
        "up_w": 0.1 * jax.random.normal(ks[0], (out_channels, in_channels, 2, 2), f32),
        "up_b": 0.1 * jax.random.normal(ks[1], (out_channels,), f32),
        "up_gamma": 1.0 + 0.1 * jax.random.normal(ks[2], (out_channels,), f32),
        "up_beta": 0.1 * jax.random.normal(ks[3], (out_channels,), f32),
        # Double_Conv(out_channels*2, out_channels)
        "c1_w": 0.1 * jax.random.normal(ks[4], (out_channels, 2 * out_channels, 3, 3), f32),
        "c1_b": 0.1 * jax.random.normal(ks[5], (out_channels,), f32),
        "c2_w": 0.1 * jax.random.normal(ks[6], (out_channels, out_channels, 3, 3), f32),
        "c2_b": 0.1 * jax.random.normal(ks[7], (out_channels,), f32),
        "dc_gamma": 1.0 + 0.1 * jax.random.normal(ks[8], (out_channels,), f32),
        "dc_beta": 0.1 * jax.random.normal(ks[9], (out_channels,), f32),
    }

    kx1, kx2 = jax.random.split(jax.random.PRNGKey(1))
    x1 = jax.random.normal(kx1, (N, in_channels, H, W), f32)           # deep features
    x2 = jax.random.normal(kx2, (N, out_channels, 2 * H, 2 * W), f32)  # skip connection

    out = jax.block_until_ready(jax.jit(up_forward)(params, x1, x2))
    ref_b = jax.block_until_ready(ref_forward_bf16(params, x1, x2))
    ref_f = jax.block_until_ready(ref_forward_f32(params, x1, x2))

    assert out.shape == (N, out_channels, 2 * H, 2 * W), out.shape
    # Tight check vs a reference that rounds to bf16 at the same points as the kernel.
    assert jnp.allclose(out, ref_b, rtol=2e-2, atol=2e-2), \
        float(jnp.max(jnp.abs(out - ref_b)))
    # Loose check vs the exact-f32 module math (bf16 MXU operands / intermediates).
    assert jnp.allclose(out, ref_f, rtol=1e-1, atol=1e-1), \
        float(jnp.max(jnp.abs(out - ref_f)))

    print("KERNEL_OK")
</pallas_src>

<mosaic_0001>
module attributes {stable_mosaic.version = 11 : i64} {
  func.func @_scale_shift_kernel(%arg0: i32, %arg1: memref<1x4x240xbf16, #tpu.memory_space<vmem>>, %arg2: memref<4x1xf32, #tpu.memory_space<vmem>>, %arg3: memref<4x1xf32, #tpu.memory_space<vmem>>, %arg4: memref<1x4x240xbf16, #tpu.memory_space<vmem>>) attributes {dimension_semantics = [#tpu.dimension_semantics<parallel>], iteration_bounds = array<i64: 2>, scalar_prefetch = 0 : i64, scratch_operands = 0 : i64, tpu.core_type = #tpu.core_type<tc>, window_params = [{transform_indices = @transform_0, window_bounds = array<i64: 1, 4, 240>}, {pipeline_mode = #tpu.pipeline_mode<synchronous>, transform_indices = @transform_1, window_bounds = array<i64: 4, 1>}, {pipeline_mode = #tpu.pipeline_mode<synchronous>, transform_indices = @transform_2, window_bounds = array<i64: 4, 1>}, {transform_indices = @transform_3, window_bounds = array<i64: 1, 4, 240>}]} {
    %c0 = arith.constant 0 : index
    %c0_0 = arith.constant 0 : index
    %c0_1 = arith.constant 0 : index
    %0 = vector.load %arg1[%c0, %c0_0, %c0_1] : memref<1x4x240xbf16, #tpu.memory_space<vmem>>, vector<1x4x240xbf16>
    %1 = vector.shape_cast %0 : vector<1x4x240xbf16> to vector<4x240xbf16>
    %2 = arith.extf %1 : vector<4x240xbf16> to vector<4x240xf32>
    %c0_2 = arith.constant 0 : index
    %c0_3 = arith.constant 0 : index
    %3 = vector.load %arg2[%c0_2, %c0_3] : memref<4x1xf32, #tpu.memory_space<vmem>>, vector<4x1xf32>
    %4 = vector.broadcast %3 : vector<4x1xf32> to vector<4x240xf32>
    %5 = arith.mulf %2, %4 : vector<4x240xf32>
    %c0_4 = arith.constant 0 : index
    %c0_5 = arith.constant 0 : index
    %6 = vector.load %arg3[%c0_4, %c0_5] : memref<4x1xf32, #tpu.memory_space<vmem>>, vector<4x1xf32>
    %7 = vector.broadcast %6 : vector<4x1xf32> to vector<4x240xf32>
    %8 = arith.addf %5, %7 : vector<4x240xf32>
    %9 = arith.truncf %8 : vector<4x240xf32> to vector<4x240xbf16>
    %c0_6 = arith.constant 0 : index
    %c0_7 = arith.constant 0 : index
    %c0_8 = arith.constant 0 : index
    %10 = vector.load %arg4[%c0_6, %c0_7, %c0_8] : memref<1x4x240xbf16, #tpu.memory_space<vmem>>, vector<1x4x240xbf16>
    %11 = vector.shape_cast %10 : vector<1x4x240xbf16> to vector<4x240xbf16>
    %12 = vector.shape_cast %9 : vector<4x240xbf16> to vector<1x4x240xbf16>
    tpu.vector_store %arg4[%c0_6, %c0_7, %c0_8], %12 {strides = array<i32>} : memref<1x4x240xbf16, #tpu.memory_space<vmem>>, vector<1x4x240xbf16>,
    return
  }
  func.func @transform_0(%arg0: i32) -> (i32, i32, i32) {
    %c0_i32 = arith.constant 0 : i32
    %c0_i32_0 = arith.constant 0 : i32
    %c0_i32_1 = arith.constant 0 : i32
    return %arg0, %c0_i32, %c0_i32_0 : i32, i32, i32
  }
  func.func @transform_1(%arg0: i32) -> (i32, i32) {
    %c0_i32 = arith.constant 0 : i32
    %c0_i32_0 = arith.constant 0 : i32
    %c0_i32_1 = arith.constant 0 : i32
    return %c0_i32, %c0_i32_0 : i32, i32
  }
  func.func @transform_2(%arg0: i32) -> (i32, i32) {
    %c0_i32 = arith.constant 0 : i32
    %c0_i32_0 = arith.constant 0 : i32
    %c0_i32_1 = arith.constant 0 : i32
    return %c0_i32, %c0_i32_0 : i32, i32
  }
  func.func @transform_3(%arg0: i32) -> (i32, i32, i32) {
    %c0_i32 = arith.constant 0 : i32
    %c0_i32_0 = arith.constant 0 : i32
    %c0_i32_1 = arith.constant 0 : i32
    return %arg0, %c0_i32, %c0_i32_0 : i32, i32, i32
  }
}

module attributes {stable_mosaic.version = 11 : i64} {
  func.func @_conv_img_kernel(%arg0: i32, %arg1: memref<1x8x257xbf16, #tpu.memory_space<vmem>>, %arg2: memref<4x4x8xbf16, #tpu.memory_space<vmem>>, %arg3: memref<4x1xf32, #tpu.memory_space<vmem>>, %arg4: memref<1x4x240xbf16, #tpu.memory_space<vmem>>, %arg5: memref<1x4x1xf32, #tpu.memory_space<vmem>>, %arg6: memref<1x4x1xf32, #tpu.memory_space<vmem>>) attributes {dimension_semantics = [#tpu.dimension_semantics<parallel>], iteration_bounds = array<i64: 2>, scalar_prefetch = 0 : i64, scratch_operands = 0 : i64, tpu.core_type = #tpu.core_type<tc>, window_params = [{transform_indices = @transform_0, window_bounds = array<i64: 1, 8, 257>}, {pipeline_mode = #tpu.pipeline_mode<synchronous>, transform_indices = @transform_1, window_bounds = array<i64: 4, 4, 8>}, {pipeline_mode = #tpu.pipeline_mode<synchronous>, transform_indices = @transform_2, window_bounds = array<i64: 4, 1>}, {transform_indices = @transform_3, window_bounds = array<i64: 1, 4, 240>}, {transform_indices = @transform_4, window_bounds = array<i64: 1, 4, 1>}, {transform_indices = @transform_5, window_bounds = array<i64: 1, 4, 1>}]} {
    %c0 = arith.constant 0 : index
    %c0_0 = arith.constant 0 : index
    %c0_1 = arith.constant 0 : index
    %0 = vector.load %arg1[%c0, %c0_0, %c0_1] : memref<1x8x257xbf16, #tpu.memory_space<vmem>>, vector<1x8x257xbf16>
    %1 = vector.shape_cast %0 : vector<1x8x257xbf16> to vector<8x257xbf16>
    %cst = arith.constant 0.000000e+00 : f32
    %2 = vector.broadcast %cst : f32 to vector<4x240xf32>
    %c0_2 = arith.constant 0 : index
    %c0_3 = arith.constant 0 : index
    %c0_4 = arith.constant 0 : index
    %3 = vector.load %arg2[%c0_2, %c0_3, %c0_4] : memref<4x4x8xbf16, #tpu.memory_space<vmem>>, vector<1x4x8xbf16>
    %4 = vector.shape_cast %3 : vector<1x4x8xbf16> to vector<4x8xbf16>
    %5 = vector.extract_strided_slice %1 {offsets = [0, 0], sizes = [8, 240], strides = [1, 1]} : vector<8x257xbf16> to vector<8x240xbf16>
    %cst_5 = arith.constant dense<0.000000e+00> : vector<4x240xf32>
    %6 = tpu.matmul %4, %5, %cst_5 {dimension_numbers = #tpu.dot_dimension_numbers<[1], [0], [0], [1], [0, 0, 1, 1], [], []>} : vector<4x8xbf16>, vector<8x240xbf16>, vector<4x240xf32> -> vector<4x240xf32>
    %7 = arith.addf %2, %6 : vector<4x240xf32>
    %c1 = arith.constant 1 : index
    %c0_6 = arith.constant 0 : index
    %c0_7 = arith.constant 0 : index
    %8 = vector.load %arg2[%c1, %c0_6, %c0_7] : memref<4x4x8xbf16, #tpu.memory_space<vmem>>, vector<1x4x8xbf16>
    %9 = vector.shape_cast %8 : vector<1x4x8xbf16> to vector<4x8xbf16>
    %10 = vector.extract_strided_slice %1 {offsets = [0, 1], sizes = [8, 240], strides = [1, 1]} : vector<8x257xbf16> to vector<8x240xbf16>
    %cst_8 = arith.constant dense<0.000000e+00> : vector<4x240xf32>
    %11 = tpu.matmul %9, %10, %cst_8 {dimension_numbers = #tpu.dot_dimension_numbers<[1], [0], [0], [1], [0, 0, 1, 1], [], []>} : vector<4x8xbf16>, vector<8x240xbf16>, vector<4x240xf32> -> vector<4x240xf32>
    %12 = arith.addf %7, %11 : vector<4x240xf32>
    %c2 = arith.constant 2 : index
    %c0_9 = arith.constant 0 : index
    %c0_10 = arith.constant 0 : index
    %13 = vector.load %arg2[%c2, %c0_9, %c0_10] : memref<4x4x8xbf16, #tpu.memory_space<vmem>>, vector<1x4x8xbf16>
    %14 = vector.shape_cast %13 : vector<1x4x8xbf16> to vector<4x8xbf16>
    %15 = vector.extract_strided_slice %1 {offsets = [0, 16], sizes = [8, 240], strides = [1, 1]} : vector<8x257xbf16> to vector<8x240xbf16>
    %cst_11 = arith.constant dense<0.000000e+00> : vector<4x240xf32>
    %16 = tpu.matmul %14, %15, %cst_11 {dimension_numbers = #tpu.dot_dimension_numbers<[1], [0], [0], [1], [0, 0, 1, 1], [], []>} : vector<4x8xbf16>, vector<8x240xbf16>, vector<4x240xf32> -> vector<4x240xf32>
    %17 = arith.addf %12, %16 : vector<4x240xf32>
    %c3 = arith.constant 3 : index
    %c0_12 = arith.constant 0 : index
    %c0_13 = arith.constant 0 : index
    %18 = vector.load %arg2[%c3, %c0_12, %c0_13] : memref<4x4x8xbf16, #tpu.memory_space<vmem>>, vector<1x4x8xbf16>
    %19 = vector.shape_cast %18 : vector<1x4x8xbf16> to vector<4x8xbf16>
    %20 = vector.extract_strided_slice %1 {offsets = [0, 17], sizes = [8, 240], strides = [1, 1]} : vector<8x257xbf16> to vector<8x240xbf16>
    %cst_14 = arith.constant dense<0.000000e+00> : vector<4x240xf32>
    %21 = tpu.matmul %19, %20, %cst_14 {dimension_numbers = #tpu.dot_dimension_numbers<[1], [0], [0], [1], [0, 0, 1, 1], [], []>} : vector<4x8xbf16>, vector<8x240xbf16>, vector<4x240xf32> -> vector<4x240xf32>
    %22 = arith.addf %17, %21 : vector<4x240xf32>
    %c0_15 = arith.constant 0 : index
    %c0_16 = arith.constant 0 : index
    %23 = vector.load %arg3[%c0_15, %c0_16] : memref<4x1xf32, #tpu.memory_space<vmem>>, vector<4x1xf32>
    %24 = vector.broadcast %23 : vector<4x1xf32> to vector<4x240xf32>
    %25 = arith.addf %22, %24 : vector<4x240xf32>
    %cst_17 = arith.constant 0.000000e+00 : f32
    %26 = vector.broadcast %cst_17 : f32 to vector<4x240xf32>
    %27 = arith.maximumf %25, %26 : vector<4x240xf32>
    %28 = arith.truncf %27 : vector<4x240xf32> to vector<4x240xbf16>
    %c0_18 = arith.constant 0 : index
    %c0_19 = arith.constant 0 : index
    %c0_20 = arith.constant 0 : index
    %29 = vector.load %arg4[%c0_18, %c0_19, %c0_20] : memref<1x4x240xbf16, #tpu.memory_space<vmem>>, vector<1x4x240xbf16>
    %30 = vector.shape_cast %29 : vector<1x4x240xbf16> to vector<4x240xbf16>
    %31 = vector.shape_cast %28 : vector<4x240xbf16> to vector<1x4x240xbf16>
    tpu.vector_store %arg4[%c0_18, %c0_19, %c0_20], %31 {strides = array<i32>} : memref<1x4x240xbf16, #tpu.memory_space<vmem>>, vector<1x4x240xbf16>,
    %32 = tpu.iota {dimensions = array<i32: 1>} : vector<1x240xi32>
    %c16_i32 = arith.constant 16 : i32
    %c0_i32 = arith.constant 0 : i32
    %33 = arith.cmpi eq, %c16_i32, %c0_i32 : i32
    %c1_i32 = arith.constant 1 : i32
    %34 = arith.select %33, %c1_i32, %c16_i32 : i32
    %35 = vector.broadcast %34 : i32 to vector<1x240xi32>
    %36 = arith.remsi %32, %35 : vector<1x240xi32>
    %c0_i32_21 = arith.constant 0 : i32
    %37 = vector.broadcast %c0_i32_21 : i32 to vector<1x240xi32>
    %38 = arith.cmpi ne, %36, %37 : vector<1x240xi32>
    %c0_i32_22 = arith.constant 0 : i32
    %39 = vector.broadcast %c0_i32_22 : i32 to vector<1x240xi32>
    %40 = arith.cmpi slt, %36, %39 : vector<1x240xi32>
    %c0_i32_23 = arith.constant 0 : i32
    %41 = arith.cmpi slt, %34, %c0_i32_23 : i32
    %42 = vector.broadcast %41 : i1 to vector<1x240xi1>
    %43 = vector.broadcast %42 : vector<1x240xi1> to vector<1x240xi1>
    %44 = arith.xori %40, %43 : vector<1x240xi1>
    %45 = arith.andi %44, %38 : vector<1x240xi1>
    %46 = vector.broadcast %34 : i32 to vector<1x240xi32>
    %47 = arith.addi %36, %46 : vector<1x240xi32>
    %48 = arith.select %45, %47, %36 : vector<1x240xi1>, vector<1x240xi32>
    %c15_i32 = arith.constant 15 : i32
    %49 = vector.broadcast %c15_i32 : i32 to vector<1x240xi32>
    %50 = arith.cmpi slt, %48, %49 : vector<1x240xi32>
    %cst_24 = arith.constant 0.000000e+00 : f32
    %51 = vector.shape_cast %50 : vector<1x240xi1> to vector<1x240xi1>
    %52 = vector.broadcast %51 : vector<1x240xi1> to vector<4x240xi1>
    %53 = vector.broadcast %cst_24 : f32 to vector<4x240xf32>
    %54 = arith.select %52, %27, %53 : vector<4x240xi1>, vector<4x240xf32>
    %cst_25 = arith.constant dense<0.000000e+00> : vector<4xf32>
    %55 = vector.multi_reduction <add>, %54, %cst_25 [1] : vector<4x240xf32> to vector<4xf32>
    %56 = vector.shape_cast %55 : vector<4xf32> to vector<4x1xf32>
    %c0_26 = arith.constant 0 : index
    %c0_27 = arith.constant 0 : index
    %c0_28 = arith.constant 0 : index
    %57 = vector.load %arg5[%c0_26, %c0_27, %c0_28] : memref<1x4x1xf32, #tpu.memory_space<vmem>>, vector<1x4x1xf32>
    %58 = vector.shape_cast %57 : vector<1x4x1xf32> to vector<4x1xf32>
    %59 = vector.shape_cast %56 : vector<4x1xf32> to vector<1x4x1xf32>
    tpu.vector_store %arg5[%c0_26, %c0_27, %c0_28], %59 {strides = array<i32>} : memref<1x4x1xf32, #tpu.memory_space<vmem>>, vector<1x4x1xf32>,
    %60 = arith.mulf %54, %54 : vector<4x240xf32>
    %cst_29 = arith.constant dense<0.000000e+00> : vector<4xf32>
    %61 = vector.multi_reduction <add>, %60, %cst_29 [1] : vector<4x240xf32> to vector<4xf32>
    %62 = vector.shape_cast %61 : vector<4xf32> to vector<4x1xf32>
    %c0_30 = arith.constant 0 : index
    %c0_31 = arith.constant 0 : index
    %c0_32 = arith.constant 0 : index
    %63 = vector.load %arg6[%c0_30, %c0_31, %c0_32] : memref<1x4x1xf32, #tpu.memory_space<vmem>>, vector<1x4x1xf32>
    %64 = vector.shape_cast %63 : vector<1x4x1xf32> to vector<4x1xf32>
    %65 = vector.shape_cast %62 : vector<4x1xf32> to vector<1x4x1xf32>
    tpu.vector_store %arg6[%c0_30, %c0_31, %c0_32], %65 {strides = array<i32>} : memref<1x4x1xf32, #tpu.memory_space<vmem>>, vector<1x4x1xf32>,
    return
  }
  func.func @transform_0(%arg0: i32) -> (i32, i32, i32) {
    %c0_i32 = arith.constant 0 : i32
    %c0_i32_0 = arith.constant 0 : i32
    %c0_i32_1 = arith.constant 0 : i32
    return %arg0, %c0_i32, %c0_i32_0 : i32, i32, i32
  }
  func.func @transform_1(%arg0: i32) -> (i32, i32, i32) {
    %c0_i32 = arith.constant 0 : i32
    %c0_i32_0 = arith.constant 0 : i32
    %c0_i32_1 = arith.constant 0 : i32
    %c0_i32_2 = arith.constant 0 : i32
    return %c0_i32, %c0_i32_0, %c0_i32_1 : i32, i32, i32
  }
  func.func @transform_2(%arg0: i32) -> (i32, i32) {
    %c0_i32 = arith.constant 0 : i32
    %c0_i32_0 = arith.constant 0 : i32
    %c0_i32_1 = arith.constant 0 : i32
    return %c0_i32, %c0_i32_0 : i32, i32
  }
  func.func @transform_3(%arg0: i32) -> (i32, i32, i32) {
    %c0_i32 = arith.constant 0 : i32
    %c0_i32_0 = arith.constant 0 : i32
    %c0_i32_1 = arith.constant 0 : i32
    return %arg0, %c0_i32, %c0_i32_0 : i32, i32, i32
  }
  func.func @transform_4(%arg0: i32) -> (i32, i32, i32) {
    %c0_i32 = arith.constant 0 : i32
    %c0_i32_0 = arith.constant 0 : i32
    %c0_i32_1 = arith.constant 0 : i32
    return %arg0, %c0_i32, %c0_i32_0 : i32, i32, i32
  }
  func.func @transform_5(%arg0: i32) -> (i32, i32, i32) {
    %c0_i32 = arith.constant 0 : i32
    %c0_i32_0 = arith.constant 0 : i32
    %c0_i32_1 = arith.constant 0 : i32
    return %arg0, %c0_i32, %c0_i32_0 : i32, i32, i32
  }
}

module attributes {stable_mosaic.version = 11 : i64} {
  func.func @_conv_img_kernel(%arg0: i32, %arg1: memref<1x8x326xbf16, #tpu.memory_space<vmem>>, %arg2: memref<9x4x8xbf16, #tpu.memory_space<vmem>>, %arg3: memref<4x1xf32, #tpu.memory_space<vmem>>, %arg4: memref<1x4x288xbf16, #tpu.memory_space<vmem>>) attributes {dimension_semantics = [#tpu.dimension_semantics<parallel>], iteration_bounds = array<i64: 2>, scalar_prefetch = 0 : i64, scratch_operands = 0 : i64, tpu.core_type = #tpu.core_type<tc>, window_params = [{transform_indices = @transform_0, window_bounds = array<i64: 1, 8, 326>}, {pipeline_mode = #tpu.pipeline_mode<synchronous>, transform_indices = @transform_1, window_bounds = array<i64: 9, 4, 8>}, {pipeline_mode = #tpu.pipeline_mode<synchronous>, transform_indices = @transform_2, window_bounds = array<i64: 4, 1>}, {transform_indices = @transform_3, window_bounds = array<i64: 1, 4, 288>}]} {
    %c0 = arith.constant 0 : index
    %c0_0 = arith.constant 0 : index
    %c0_1 = arith.constant 0 : index
    %0 = vector.load %arg1[%c0, %c0_0, %c0_1] : memref<1x8x326xbf16, #tpu.memory_space<vmem>>, vector<1x8x326xbf16>
    %1 = vector.shape_cast %0 : vector<1x8x326xbf16> to vector<8x326xbf16>
    %cst = arith.constant 0.000000e+00 : f32
    %2 = vector.broadcast %cst : f32 to vector<4x288xf32>
    %c0_2 = arith.constant 0 : index
    %c0_3 = arith.constant 0 : index
    %c0_4 = arith.constant 0 : index
    %3 = vector.load %arg2[%c0_2, %c0_3, %c0_4] : memref<9x4x8xbf16, #tpu.memory_space<vmem>>, vector<1x4x8xbf16>
    %4 = vector.shape_cast %3 : vector<1x4x8xbf16> to vector<4x8xbf16>
    %5 = vector.extract_strided_slice %1 {offsets = [0, 0], sizes = [8, 288], strides = [1, 1]} : vector<8x326xbf16> to vector<8x288xbf16>
    %cst_5 = arith.constant dense<0.000000e+00> : vector<4x288xf32>
    %6 = tpu.matmul %4, %5, %cst_5 {dimension_numbers = #tpu.dot_dimension_numbers<[1], [0], [0], [1], [0, 0, 1, 1], [], []>} : vector<4x8xbf16>, vector<8x288xbf16>, vector<4x288xf32> -> vector<4x288xf32>
    %7 = arith.addf %2, %6 : vector<4x288xf32>
    %c1 = arith.constant 1 : index
    %c0_6 = arith.constant 0 : index
    %c0_7 = arith.constant 0 : index
    %8 = vector.load %arg2[%c1, %c0_6, %c0_7] : memref<9x4x8xbf16, #tpu.memory_space<vmem>>, vector<1x4x8xbf16>
    %9 = vector.shape_cast %8 : vector<1x4x8xbf16> to vector<4x8xbf16>
    %10 = vector.extract_strided_slice %1 {offsets = [0, 1], sizes = [8, 288], strides = [1, 1]} : vector<8x326xbf16> to vector<8x288xbf16>
    %cst_8 = arith.constant dense<0.000000e+00> : vector<4x288xf32>
    %11 = tpu.matmul %9, %10, %cst_8 {dimension_numbers = #tpu.dot_dimension_numbers<[1], [0], [0], [1], [0, 0, 1, 1], [], []>} : vector<4x8xbf16>, vector<8x288xbf16>, vector<4x288xf32> -> vector<4x288xf32>
    %12 = arith.addf %7, %11 : vector<4x288xf32>
    %c2 = arith.constant 2 : index
    %c0_9 = arith.constant 0 : index
    %c0_10 = arith.constant 0 : index
    %13 = vector.load %arg2[%c2, %c0_9, %c0_10] : memref<9x4x8xbf16, #tpu.memory_space<vmem>>, vector<1x4x8xbf16>
    %14 = vector.shape_cast %13 : vector<1x4x8xbf16> to vector<4x8xbf16>
    %15 = vector.extract_strided_slice %1 {offsets = [0, 2], sizes = [8, 288], strides = [1, 1]} : vector<8x326xbf16> to vector<8x288xbf16>
    %cst_11 = arith.constant dense<0.000000e+00> : vector<4x288xf32>
    %16 = tpu.matmul %14, %15, %cst_11 {dimension_numbers = #tpu.dot_dimension_numbers<[1], [0], [0], [1], [0, 0, 1, 1], [], []>} : vector<4x8xbf16>, vector<8x288xbf16>, vector<4x288xf32> -> vector<4x288xf32>
    %17 = arith.addf %12, %16 : vector<4x288xf32>
    %c3 = arith.constant 3 : index
    %c0_12 = arith.constant 0 : index
    %c0_13 = arith.constant 0 : index
    %18 = vector.load %arg2[%c3, %c0_12, %c0_13] : memref<9x4x8xbf16, #tpu.memory_space<vmem>>, vector<1x4x8xbf16>
    %19 = vector.shape_cast %18 : vector<1x4x8xbf16> to vector<4x8xbf16>
    %20 = vector.extract_strided_slice %1 {offsets = [0, 18], sizes = [8, 288], strides = [1, 1]} : vector<8x326xbf16> to vector<8x288xbf16>
    %cst_14 = arith.constant dense<0.000000e+00> : vector<4x288xf32>
    %21 = tpu.matmul %19, %20, %cst_14 {dimension_numbers = #tpu.dot_dimension_numbers<[1], [0], [0], [1], [0, 0, 1, 1], [], []>} : vector<4x8xbf16>, vector<8x288xbf16>, vector<4x288xf32> -> vector<4x288xf32>
    %22 = arith.addf %17, %21 : vector<4x288xf32>
    %c4 = arith.constant 4 : index
    %c0_15 = arith.constant 0 : index
    %c0_16 = arith.constant 0 : index
    %23 = vector.load %arg2[%c4, %c0_15, %c0_16] : memref<9x4x8xbf16, #tpu.memory_space<vmem>>, vector<1x4x8xbf16>
    %24 = vector.shape_cast %23 : vector<1x4x8xbf16> to vector<4x8xbf16>
    %25 = vector.extract_strided_slice %1 {offsets = [0, 19], sizes = [8, 288], strides = [1, 1]} : vector<8x326xbf16> to vector<8x288xbf16>
    %cst_17 = arith.constant dense<0.000000e+00> : vector<4x288xf32>
    %26 = tpu.matmul %24, %25, %cst_17 {dimension_numbers = #tpu.dot_dimension_numbers<[1], [0], [0], [1], [0, 0, 1, 1], [], []>} : vector<4x8xbf16>, vector<8x288xbf16>, vector<4x288xf32> -> vector<4x288xf32>
    %27 = arith.addf %22, %26 : vector<4x288xf32>
    %c5 = arith.constant 5 : index
    %c0_18 = arith.constant 0 : index
    %c0_19 = arith.constant 0 : index
    %28 = vector.load %arg2[%c5, %c0_18, %c0_19] : memref<9x4x8xbf16, #tpu.memory_space<vmem>>, vector<1x4x8xbf16>
    %29 = vector.shape_cast %28 : vector<1x4x8xbf16> to vector<4x8xbf16>
    %30 = vector.extract_strided_slice %1 {offsets = [0, 20], sizes = [8, 288], strides = [1, 1]} : vector<8x326xbf16> to vector<8x288xbf16>
    %cst_20 = arith.constant dense<0.000000e+00> : vector<4x288xf32>
    %31 = tpu.matmul %29, %30, %cst_20 {dimension_numbers = #tpu.dot_dimension_numbers<[1], [0], [0], [1], [0, 0, 1, 1], [], []>} : vector<4x8xbf16>, vector<8x288xbf16>, vector<4x288xf32> -> vector<4x288xf32>
    %32 = arith.addf %27, %31 : vector<4x288xf32>
    %c6 = arith.constant 6 : index
    %c0_21 = arith.constant 0 : index
    %c0_22 = arith.constant 0 : index
    %33 = vector.load %arg2[%c6, %c0_21, %c0_22] : memref<9x4x8xbf16, #tpu.memory_space<vmem>>, vector<1x4x8xbf16>
    %34 = vector.shape_cast %33 : vector<1x4x8xbf16> to vector<4x8xbf16>
    %35 = vector.extract_strided_slice %1 {offsets = [0, 36], sizes = [8, 288], strides = [1, 1]} : vector<8x326xbf16> to vector<8x288xbf16>
    %cst_23 = arith.constant dense<0.000000e+00> : vector<4x288xf32>
    %36 = tpu.matmul %34, %35, %cst_23 {dimension_numbers = #tpu.dot_dimension_numbers<[1], [0], [0], [1], [0, 0, 1, 1], [], []>} : vector<4x8xbf16>, vector<8x288xbf16>, vector<4x288xf32> -> vector<4x288xf32>
    %37 = arith.addf %32, %36 : vector<4x288xf32>
    %c7 = arith.constant 7 : index
    %c0_24 = arith.constant 0 : index
    %c0_25 = arith.constant 0 : index
    %38 = vector.load %arg2[%c7, %c0_24, %c0_25] : memref<9x4x8xbf16, #tpu.memory_space<vmem>>, vector<1x4x8xbf16>
    %39 = vector.shape_cast %38 : vector<1x4x8xbf16> to vector<4x8xbf16>
    %40 = vector.extract_strided_slice %1 {offsets = [0, 37], sizes = [8, 288], strides = [1, 1]} : vector<8x326xbf16> to vector<8x288xbf16>
    %cst_26 = arith.constant dense<0.000000e+00> : vector<4x288xf32>
    %41 = tpu.matmul %39, %40, %cst_26 {dimension_numbers = #tpu.dot_dimension_numbers<[1], [0], [0], [1], [0, 0, 1, 1], [], []>} : vector<4x8xbf16>, vector<8x288xbf16>, vector<4x288xf32> -> vector<4x288xf32>
    %42 = arith.addf %37, %41 : vector<4x288xf32>
    %c8 = arith.constant 8 : index
    %c0_27 = arith.constant 0 : index
    %c0_28 = arith.constant 0 : index
    %43 = vector.load %arg2[%c8, %c0_27, %c0_28] : memref<9x4x8xbf16, #tpu.memory_space<vmem>>, vector<1x4x8xbf16>
    %44 = vector.shape_cast %43 : vector<1x4x8xbf16> to vector<4x8xbf16>
    %45 = vector.extract_strided_slice %1 {offsets = [0, 38], sizes = [8, 288], strides = [1, 1]} : vector<8x326xbf16> to vector<8x288xbf16>
    %cst_29 = arith.constant dense<0.000000e+00> : vector<4x288xf32>
    %46 = tpu.matmul %44, %45, %cst_29 {dimension_numbers = #tpu.dot_dimension_numbers<[1], [0], [0], [1], [0, 0, 1, 1], [], []>} : vector<4x8xbf16>, vector<8x288xbf16>, vector<4x288xf32> -> vector<4x288xf32>
    %47 = arith.addf %42, %46 : vector<4x288xf32>
    %c0_30 = arith.constant 0 : index
    %c0_31 = arith.constant 0 : index
    %48 = vector.load %arg3[%c0_30, %c0_31] : memref<4x1xf32, #tpu.memory_space<vmem>>, vector<4x1xf32>
    %49 = vector.broadcast %48 : vector<4x1xf32> to vector<4x288xf32>
    %50 = arith.addf %47, %49 : vector<4x288xf32>
    %cst_32 = arith.constant 0.000000e+00 : f32
    %51 = vector.broadcast %cst_32 : f32 to vector<4x288xf32>
    %52 = arith.maximumf %50, %51 : vector<4x288xf32>
    %53 = arith.truncf %52 : vector<4x288xf32> to vector<4x288xbf16>
    %c0_33 = arith.constant 0 : index
    %c0_34 = arith.constant 0 : index
    %c0_35 = arith.constant 0 : index
    %54 = vector.load %arg4[%c0_33, %c0_34, %c0_35] : memref<1x4x288xbf16, #tpu.memory_space<vmem>>, vector<1x4x288xbf16>
    %55 = vector.shape_cast %54 : vector<1x4x288xbf16> to vector<4x288xbf16>
    %56 = vector.shape_cast %53 : vector<4x288xbf16> to vector<1x4x288xbf16>
    tpu.vector_store %arg4[%c0_33, %c0_34, %c0_35], %56 {strides = array<i32>} : memref<1x4x288xbf16, #tpu.memory_space<vmem>>, vector<1x4x288xbf16>,
    return
  }
  func.func @transform_0(%arg0: i32) -> (i32, i32, i32) {
    %c0_i32 = arith.constant 0 : i32
    %c0_i32_0 = arith.constant 0 : i32
    %c0_i32_1 = arith.constant 0 : i32
    return %arg0, %c0_i32, %c0_i32_0 : i32, i32, i32
  }
  func.func @transform_1(%arg0: i32) -> (i32, i32, i32) {
    %c0_i32 = arith.constant 0 : i32
    %c0_i32_0 = arith.constant 0 : i32
    %c0_i32_1 = arith.constant 0 : i32
    %c0_i32_2 = arith.constant 0 : i32
    return %c0_i32, %c0_i32_0, %c0_i32_1 : i32, i32, i32
  }
  func.func @transform_2(%arg0: i32) -> (i32, i32) {
    %c0_i32 = arith.constant 0 : i32
    %c0_i32_0 = arith.constant 0 : i32
    %c0_i32_1 = arith.constant 0 : i32
    return %c0_i32, %c0_i32_0 : i32, i32
  }
  func.func @transform_3(%arg0: i32) -> (i32, i32, i32) {
    %c0_i32 = arith.constant 0 : i32
    %c0_i32_0 = arith.constant 0 : i32
    %c0_i32_1 = arith.constant 0 : i32
    return %arg0, %c0_i32, %c0_i32_0 : i32, i32, i32
  }
}

module attributes {stable_mosaic.version = 11 : i64} {
  func.func @_scale_shift_kernel(%arg0: i32, %arg1: memref<1x4x288xf32, #tpu.memory_space<vmem>>, %arg2: memref<4x1xf32, #tpu.memory_space<vmem>>, %arg3: memref<4x1xf32, #tpu.memory_space<vmem>>, %arg4: memref<1x4x288xf32, #tpu.memory_space<vmem>>) attributes {dimension_semantics = [#tpu.dimension_semantics<parallel>], iteration_bounds = array<i64: 2>, scalar_prefetch = 0 : i64, scratch_operands = 0 : i64, tpu.core_type = #tpu.core_type<tc>, window_params = [{transform_indices = @transform_0, window_bounds = array<i64: 1, 4, 288>}, {pipeline_mode = #tpu.pipeline_mode<synchronous>, transform_indices = @transform_1, window_bounds = array<i64: 4, 1>}, {pipeline_mode = #tpu.pipeline_mode<synchronous>, transform_indices = @transform_2, window_bounds = array<i64: 4, 1>}, {transform_indices = @transform_3, window_bounds = array<i64: 1, 4, 288>}]} {
    %c0 = arith.constant 0 : index
    %c0_0 = arith.constant 0 : index
    %c0_1 = arith.constant 0 : index
    %0 = vector.load %arg1[%c0, %c0_0, %c0_1] : memref<1x4x288xf32, #tpu.memory_space<vmem>>, vector<1x4x288xf32>
    %1 = vector.shape_cast %0 : vector<1x4x288xf32> to vector<4x288xf32>
    %c0_2 = arith.constant 0 : index
    %c0_3 = arith.constant 0 : index
    %2 = vector.load %arg2[%c0_2, %c0_3] : memref<4x1xf32, #tpu.memory_space<vmem>>, vector<4x1xf32>
    %3 = vector.broadcast %2 : vector<4x1xf32> to vector<4x288xf32>
    %4 = arith.mulf %1, %3 : vector<4x288xf32>
    %c0_4 = arith.constant 0 : index
    %c0_5 = arith.constant 0 : index
    %5 = vector.load %arg3[%c0_4, %c0_5] : memref<4x1xf32, #tpu.memory_space<vmem>>, vector<4x1xf32>
    %6 = vector.broadcast %5 : vector<4x1xf32> to vector<4x288xf32>
    %7 = arith.addf %4, %6 : vector<4x288xf32>
    %c0_6 = arith.constant 0 : index
    %c0_7 = arith.constant 0 : index
    %c0_8 = arith.constant 0 : index
    %8 = vector.load %arg4[%c0_6, %c0_7, %c0_8] : memref<1x4x288xf32, #tpu.memory_space<vmem>>, vector<1x4x288xf32>
    %9 = vector.shape_cast %8 : vector<1x4x288xf32> to vector<4x288xf32>
    %10 = vector.shape_cast %7 : vector<4x288xf32> to vector<1x4x288xf32>
    tpu.vector_store %arg4[%c0_6, %c0_7, %c0_8], %10 {strides = array<i32>} : memref<1x4x288xf32, #tpu.memory_space<vmem>>, vector<1x4x288xf32>,
    return
  }
  func.func @transform_0(%arg0: i32) -> (i32, i32, i32) {
    %c0_i32 = arith.constant 0 : i32
    %c0_i32_0 = arith.constant 0 : i32
    %c0_i32_1 = arith.constant 0 : i32
    return %arg0, %c0_i32, %c0_i32_0 : i32, i32, i32
  }
  func.func @transform_1(%arg0: i32) -> (i32, i32) {
    %c0_i32 = arith.constant 0 : i32
    %c0_i32_0 = arith.constant 0 : i32
    %c0_i32_1 = arith.constant 0 : i32
    return %c0_i32, %c0_i32_0 : i32, i32
  }
  func.func @transform_2(%arg0: i32) -> (i32, i32) {
    %c0_i32 = arith.constant 0 : i32
    %c0_i32_0 = arith.constant 0 : i32
    %c0_i32_1 = arith.constant 0 : i32
    return %c0_i32, %c0_i32_0 : i32, i32
  }
  func.func @transform_3(%arg0: i32) -> (i32, i32, i32) {
    %c0_i32 = arith.constant 0 : i32
    %c0_i32_0 = arith.constant 0 : i32
    %c0_i32_1 = arith.constant 0 : i32
    return %arg0, %c0_i32, %c0_i32_0 : i32, i32, i32
  }
}

module attributes {stable_mosaic.version = 11 : i64} {
  func.func @_conv_img_kernel(%arg0: i32, %arg1: memref<1x4x326xbf16, #tpu.memory_space<vmem>>, %arg2: memref<9x4x4xbf16, #tpu.memory_space<vmem>>, %arg3: memref<4x1xf32, #tpu.memory_space<vmem>>, %arg4: memref<1x4x288xf32, #tpu.memory_space<vmem>>, %arg5: memref<1x4x1xf32, #tpu.memory_space<vmem>>, %arg6: memref<1x4x1xf32, #tpu.memory_space<vmem>>) attributes {dimension_semantics = [#tpu.dimension_semantics<parallel>], iteration_bounds = array<i64: 2>, scalar_prefetch = 0 : i64, scratch_operands = 0 : i64, tpu.core_type = #tpu.core_type<tc>, window_params = [{transform_indices = @transform_0, window_bounds = array<i64: 1, 4, 326>}, {pipeline_mode = #tpu.pipeline_mode<synchronous>, transform_indices = @transform_1, window_bounds = array<i64: 9, 4, 4>}, {pipeline_mode = #tpu.pipeline_mode<synchronous>, transform_indices = @transform_2, window_bounds = array<i64: 4, 1>}, {transform_indices = @transform_3, window_bounds = array<i64: 1, 4, 288>}, {transform_indices = @transform_4, window_bounds = array<i64: 1, 4, 1>}, {transform_indices = @transform_5, window_bounds = array<i64: 1, 4, 1>}]} {
    %c0 = arith.constant 0 : index
    %c0_0 = arith.constant 0 : index
    %c0_1 = arith.constant 0 : index
    %0 = vector.load %arg1[%c0, %c0_0, %c0_1] : memref<1x4x326xbf16, #tpu.memory_space<vmem>>, vector<1x4x326xbf16>
    %1 = vector.shape_cast %0 : vector<1x4x326xbf16> to vector<4x326xbf16>
    %cst = arith.constant 0.000000e+00 : f32
    %2 = vector.broadcast %cst : f32 to vector<4x288xf32>
    %c0_2 = arith.constant 0 : index
    %c0_3 = arith.constant 0 : index
    %c0_4 = arith.constant 0 : index
    %3 = vector.load %arg2[%c0_2, %c0_3, %c0_4] : memref<9x4x4xbf16, #tpu.memory_space<vmem>>, vector<1x4x4xbf16>
    %4 = vector.shape_cast %3 : vector<1x4x4xbf16> to vector<4x4xbf16>
    %5 = vector.extract_strided_slice %1 {offsets = [0, 0], sizes = [4, 288], strides = [1, 1]} : vector<4x326xbf16> to vector<4x288xbf16>
    %cst_5 = arith.constant dense<0.000000e+00> : vector<4x288xf32>
    %6 = tpu.matmul %4, %5, %cst_5 {dimension_numbers = #tpu.dot_dimension_numbers<[1], [0], [0], [1], [0, 0, 1, 1], [], []>} : vector<4x4xbf16>, vector<4x288xbf16>, vector<4x288xf32> -> vector<4x288xf32>
    %7 = arith.addf %2, %6 : vector<4x288xf32>
    %c1 = arith.constant 1 : index
    %c0_6 = arith.constant 0 : index
    %c0_7 = arith.constant 0 : index
    %8 = vector.load %arg2[%c1, %c0_6, %c0_7] : memref<9x4x4xbf16, #tpu.memory_space<vmem>>, vector<1x4x4xbf16>
    %9 = vector.shape_cast %8 : vector<1x4x4xbf16> to vector<4x4xbf16>
    %10 = vector.extract_strided_slice %1 {offsets = [0, 1], sizes = [4, 288], strides = [1, 1]} : vector<4x326xbf16> to vector<4x288xbf16>
    %cst_8 = arith.constant dense<0.000000e+00> : vector<4x288xf32>
    %11 = tpu.matmul %9, %10, %cst_8 {dimension_numbers = #tpu.dot_dimension_numbers<[1], [0], [0], [1], [0, 0, 1, 1], [], []>} : vector<4x4xbf16>, vector<4x288xbf16>, vector<4x288xf32> -> vector<4x288xf32>
    %12 = arith.addf %7, %11 : vector<4x288xf32>
    %c2 = arith.constant 2 : index
    %c0_9 = arith.constant 0 : index
    %c0_10 = arith.constant 0 : index
    %13 = vector.load %arg2[%c2, %c0_9, %c0_10] : memref<9x4x4xbf16, #tpu.memory_space<vmem>>, vector<1x4x4xbf16>
    %14 = vector.shape_cast %13 : vector<1x4x4xbf16> to vector<4x4xbf16>
    %15 = vector.extract_strided_slice %1 {offsets = [0, 2], sizes = [4, 288], strides = [1, 1]} : vector<4x326xbf16> to vector<4x288xbf16>
    %cst_11 = arith.constant dense<0.000000e+00> : vector<4x288xf32>
    %16 = tpu.matmul %14, %15, %cst_11 {dimension_numbers = #tpu.dot_dimension_numbers<[1], [0], [0], [1], [0, 0, 1, 1], [], []>} : vector<4x4xbf16>, vector<4x288xbf16>, vector<4x288xf32> -> vector<4x288xf32>
    %17 = arith.addf %12, %16 : vector<4x288xf32>
    %c3 = arith.constant 3 : index
    %c0_12 = arith.constant 0 : index
    %c0_13 = arith.constant 0 : index
    %18 = vector.load %arg2[%c3, %c0_12, %c0_13] : memref<9x4x4xbf16, #tpu.memory_space<vmem>>, vector<1x4x4xbf16>
    %19 = vector.shape_cast %18 : vector<1x4x4xbf16> to vector<4x4xbf16>
    %20 = vector.extract_strided_slice %1 {offsets = [0, 18], sizes = [4, 288], strides = [1, 1]} : vector<4x326xbf16> to vector<4x288xbf16>
    %cst_14 = arith.constant dense<0.000000e+00> : vector<4x288xf32>
    %21 = tpu.matmul %19, %20, %cst_14 {dimension_numbers = #tpu.dot_dimension_numbers<[1], [0], [0], [1], [0, 0, 1, 1], [], []>} : vector<4x4xbf16>, vector<4x288xbf16>, vector<4x288xf32> -> vector<4x288xf32>
    %22 = arith.addf %17, %21 : vector<4x288xf32>
    %c4 = arith.constant 4 : index
    %c0_15 = arith.constant 0 : index
    %c0_16 = arith.constant 0 : index
    %23 = vector.load %arg2[%c4, %c0_15, %c0_16] : memref<9x4x4xbf16, #tpu.memory_space<vmem>>, vector<1x4x4xbf16>
    %24 = vector.shape_cast %23 : vector<1x4x4xbf16> to vector<4x4xbf16>
    %25 = vector.extract_strided_slice %1 {offsets = [0, 19], sizes = [4, 288], strides = [1, 1]} : vector<4x326xbf16> to vector<4x288xbf16>
    %cst_17 = arith.constant dense<0.000000e+00> : vector<4x288xf32>
    %26 = tpu.matmul %24, %25, %cst_17 {dimension_numbers = #tpu.dot_dimension_numbers<[1], [0], [0], [1], [0, 0, 1, 1], [], []>} : vector<4x4xbf16>, vector<4x288xbf16>, vector<4x288xf32> -> vector<4x288xf32>
    %27 = arith.addf %22, %26 : vector<4x288xf32>
    %c5 = arith.constant 5 : index
    %c0_18 = arith.constant 0 : index
    %c0_19 = arith.constant 0 : index
    %28 = vector.load %arg2[%c5, %c0_18, %c0_19] : memref<9x4x4xbf16, #tpu.memory_space<vmem>>, vector<1x4x4xbf16>
    %29 = vector.shape_cast %28 : vector<1x4x4xbf16> to vector<4x4xbf16>
    %30 = vector.extract_strided_slice %1 {offsets = [0, 20], sizes = [4, 288], strides = [1, 1]} : vector<4x326xbf16> to vector<4x288xbf16>
    %cst_20 = arith.constant dense<0.000000e+00> : vector<4x288xf32>
    %31 = tpu.matmul %29, %30, %cst_20 {dimension_numbers = #tpu.dot_dimension_numbers<[1], [0], [0], [1], [0, 0, 1, 1], [], []>} : vector<4x4xbf16>, vector<4x288xbf16>, vector<4x288xf32> -> vector<4x288xf32>
    %32 = arith.addf %27, %31 : vector<4x288xf32>
    %c6 = arith.constant 6 : index
    %c0_21 = arith.constant 0 : index
    %c0_22 = arith.constant 0 : index
    %33 = vector.load %arg2[%c6, %c0_21, %c0_22] : memref<9x4x4xbf16, #tpu.memory_space<vmem>>, vector<1x4x4xbf16>
    %34 = vector.shape_cast %33 : vector<1x4x4xbf16> to vector<4x4xbf16>
    %35 = vector.extract_strided_slice %1 {offsets = [0, 36], sizes = [4, 288], strides = [1, 1]} : vector<4x326xbf16> to vector<4x288xbf16>
    %cst_23 = arith.constant dense<0.000000e+00> : vector<4x288xf32>
    %36 = tpu.matmul %34, %35, %cst_23 {dimension_numbers = #tpu.dot_dimension_numbers<[1], [0], [0], [1], [0, 0, 1, 1], [], []>} : vector<4x4xbf16>, vector<4x288xbf16>, vector<4x288xf32> -> vector<4x288xf32>
    %37 = arith.addf %32, %36 : vector<4x288xf32>
    %c7 = arith.constant 7 : index
    %c0_24 = arith.constant 0 : index
    %c0_25 = arith.constant 0 : index
    %38 = vector.load %arg2[%c7, %c0_24, %c0_25] : memref<9x4x4xbf16, #tpu.memory_space<vmem>>, vector<1x4x4xbf16>
    %39 = vector.shape_cast %38 : vector<1x4x4xbf16> to vector<4x4xbf16>
    %40 = vector.extract_strided_slice %1 {offsets = [0, 37], sizes = [4, 288], strides = [1, 1]} : vector<4x326xbf16> to vector<4x288xbf16>
    %cst_26 = arith.constant dense<0.000000e+00> : vector<4x288xf32>
    %41 = tpu.matmul %39, %40, %cst_26 {dimension_numbers = #tpu.dot_dimension_numbers<[1], [0], [0], [1], [0, 0, 1, 1], [], []>} : vector<4x4xbf16>, vector<4x288xbf16>, vector<4x288xf32> -> vector<4x288xf32>
    %42 = arith.addf %37, %41 : vector<4x288xf32>
    %c8 = arith.constant 8 : index
    %c0_27 = arith.constant 0 : index
    %c0_28 = arith.constant 0 : index
    %43 = vector.load %arg2[%c8, %c0_27, %c0_28] : memref<9x4x4xbf16, #tpu.memory_space<vmem>>, vector<1x4x4xbf16>
    %44 = vector.shape_cast %43 : vector<1x4x4xbf16> to vector<4x4xbf16>
    %45 = vector.extract_strided_slice %1 {offsets = [0, 38], sizes = [4, 288], strides = [1, 1]} : vector<4x326xbf16> to vector<4x288xbf16>
    %cst_29 = arith.constant dense<0.000000e+00> : vector<4x288xf32>
    %46 = tpu.matmul %44, %45, %cst_29 {dimension_numbers = #tpu.dot_dimension_numbers<[1], [0], [0], [1], [0, 0, 1, 1], [], []>} : vector<4x4xbf16>, vector<4x288xbf16>, vector<4x288xf32> -> vector<4x288xf32>
    %47 = arith.addf %42, %46 : vector<4x288xf32>
    %c0_30 = arith.constant 0 : index
    %c0_31 = arith.constant 0 : index
    %48 = vector.load %arg3[%c0_30, %c0_31] : memref<4x1xf32, #tpu.memory_space<vmem>>, vector<4x1xf32>
    %49 = vector.broadcast %48 : vector<4x1xf32> to vector<4x288xf32>
    %50 = arith.addf %47, %49 : vector<4x288xf32>
    %cst_32 = arith.constant 0.000000e+00 : f32
    %51 = vector.broadcast %cst_32 : f32 to vector<4x288xf32>
    %52 = arith.maximumf %50, %51 : vector<4x288xf32>
    %c0_33 = arith.constant 0 : index
    %c0_34 = arith.constant 0 : index
    %c0_35 = arith.constant 0 : index
    %53 = vector.load %arg4[%c0_33, %c0_34, %c0_35] : memref<1x4x288xf32, #tpu.memory_space<vmem>>, vector<1x4x288xf32>
    %54 = vector.shape_cast %53 : vector<1x4x288xf32> to vector<4x288xf32>
    %55 = vector.shape_cast %52 : vector<4x288xf32> to vector<1x4x288xf32>
    tpu.vector_store %arg4[%c0_33, %c0_34, %c0_35], %55 {strides = array<i32>} : memref<1x4x288xf32, #tpu.memory_space<vmem>>, vector<1x4x288xf32>,
    %56 = tpu.iota {dimensions = array<i32: 1>} : vector<1x288xi32>
    %c18_i32 = arith.constant 18 : i32
    %c0_i32 = arith.constant 0 : i32
    %57 = arith.cmpi eq, %c18_i32, %c0_i32 : i32
    %c1_i32 = arith.constant 1 : i32
    %58 = arith.select %57, %c1_i32, %c18_i32 : i32
    %59 = vector.broadcast %58 : i32 to vector<1x288xi32>
    %60 = arith.remsi %56, %59 : vector<1x288xi32>
    %c0_i32_36 = arith.constant 0 : i32
    %61 = vector.broadcast %c0_i32_36 : i32 to vector<1x288xi32>
    %62 = arith.cmpi ne, %60, %61 : vector<1x288xi32>
    %c0_i32_37 = arith.constant 0 : i32
    %63 = vector.broadcast %c0_i32_37 : i32 to vector<1x288xi32>
    %64 = arith.cmpi slt, %60, %63 : vector<1x288xi32>
    %c0_i32_38 = arith.constant 0 : i32
    %65 = arith.cmpi slt, %58, %c0_i32_38 : i32
    %66 = vector.broadcast %65 : i1 to vector<1x288xi1>
    %67 = vector.broadcast %66 : vector<1x288xi1> to vector<1x288xi1>
    %68 = arith.xori %64, %67 : vector<1x288xi1>
    %69 = arith.andi %68, %62 : vector<1x288xi1>
    %70 = vector.broadcast %58 : i32 to vector<1x288xi32>
    %71 = arith.addi %60, %70 : vector<1x288xi32>
    %72 = arith.select %69, %71, %60 : vector<1x288xi1>, vector<1x288xi32>
    %c16_i32 = arith.constant 16 : i32
    %73 = vector.broadcast %c16_i32 : i32 to vector<1x288xi32>
    %74 = arith.cmpi slt, %72, %73 : vector<1x288xi32>
    %cst_39 = arith.constant 0.000000e+00 : f32
    %75 = vector.shape_cast %74 : vector<1x288xi1> to vector<1x288xi1>
    %76 = vector.broadcast %75 : vector<1x288xi1> to vector<4x288xi1>
    %77 = vector.broadcast %cst_39 : f32 to vector<4x288xf32>
    %78 = arith.select %76, %52, %77 : vector<4x288xi1>, vector<4x288xf32>
    %cst_40 = arith.constant dense<0.000000e+00> : vector<4xf32>
    %79 = vector.multi_reduction <add>, %78, %cst_40 [1] : vector<4x288xf32> to vector<4xf32>
    %80 = vector.shape_cast %79 : vector<4xf32> to vector<4x1xf32>
    %c0_41 = arith.constant 0 : index
    %c0_42 = arith.constant 0 : index
    %c0_43 = arith.constant 0 : index
    %81 = vector.load %arg5[%c0_41, %c0_42, %c0_43] : memref<1x4x1xf32, #tpu.memory_space<vmem>>, vector<1x4x1xf32>
    %82 = vector.shape_cast %81 : vector<1x4x1xf32> to vector<4x1xf32>
    %83 = vector.shape_cast %80 : vector<4x1xf32> to vector<1x4x1xf32>
    tpu.vector_store %arg5[%c0_41, %c0_42, %c0_43], %83 {strides = array<i32>} : memref<1x4x1xf32, #tpu.memory_space<vmem>>, vector<1x4x1xf32>,
    %84 = arith.mulf %78, %78 : vector<4x288xf32>
    %cst_44 = arith.constant dense<0.000000e+00> : vector<4xf32>
    %85 = vector.multi_reduction <add>, %84, %cst_44 [1] : vector<4x288xf32> to vector<4xf32>
    %86 = vector.shape_cast %85 : vector<4xf32> to vector<4x1xf32>
    %c0_45 = arith.constant 0 : index
    %c0_46 = arith.constant 0 : index
    %c0_47 = arith.constant 0 : index
    %87 = vector.load %arg6[%c0_45, %c0_46, %c0_47] : memref<1x4x1xf32, #tpu.memory_space<vmem>>, vector<1x4x1xf32>
    %88 = vector.shape_cast %87 : vector<1x4x1xf32> to vector<4x1xf32>
    %89 = vector.shape_cast %86 : vector<4x1xf32> to vector<1x4x1xf32>
    tpu.vector_store %arg6[%c0_45, %c0_46, %c0_47], %89 {strides = array<i32>} : memref<1x4x1xf32, #tpu.memory_space<vmem>>, vector<1x4x1xf32>,
    return
  }
  func.func @transform_0(%arg0: i32) -> (i32, i32, i32) {
    %c0_i32 = arith.constant 0 : i32
    %c0_i32_0 = arith.constant 0 : i32
    %c0_i32_1 = arith.constant 0 : i32
    return %arg0, %c0_i32, %c0_i32_0 : i32, i32, i32
  }
  func.func @transform_1(%arg0: i32) -> (i32, i32, i32) {
    %c0_i32 = arith.constant 0 : i32
    %c0_i32_0 = arith.constant 0 : i32
    %c0_i32_1 = arith.constant 0 : i32
    %c0_i32_2 = arith.constant 0 : i32
    return %c0_i32, %c0_i32_0, %c0_i32_1 : i32, i32, i32
  }
  func.func @transform_2(%arg0: i32) -> (i32, i32) {
    %c0_i32 = arith.constant 0 : i32
    %c0_i32_0 = arith.constant 0 : i32
    %c0_i32_1 = arith.constant 0 : i32
    return %c0_i32, %c0_i32_0 : i32, i32
  }
  func.func @transform_3(%arg0: i32) -> (i32, i32, i32) {
    %c0_i32 = arith.constant 0 : i32
    %c0_i32_0 = arith.constant 0 : i32
    %c0_i32_1 = arith.constant 0 : i32
    return %arg0, %c0_i32, %c0_i32_0 : i32, i32, i32
  }
  func.func @transform_4(%arg0: i32) -> (i32, i32, i32) {
    %c0_i32 = arith.constant 0 : i32
    %c0_i32_0 = arith.constant 0 : i32
    %c0_i32_1 = arith.constant 0 : i32
    return %arg0, %c0_i32, %c0_i32_0 : i32, i32, i32
  }
  func.func @transform_5(%arg0: i32) -> (i32, i32, i32) {
    %c0_i32 = arith.constant 0 : i32
    %c0_i32_0 = arith.constant 0 : i32
    %c0_i32_1 = arith.constant 0 : i32
    return %arg0, %c0_i32, %c0_i32_0 : i32, i32, i32
  }
}

</mosaic_0001>

<bundles_post_ra>
// kernel: up_forward.6
= control target key start
LH: loop header
LB: loop body
LE: loop exit
PB: predicated region body
PF: predicated region fallthrough
CT: control target
= control target key end

     0   :  { %s333_s12 = smov 0   ;;  %s356_s0 = inlined_call_operand.vmem [shape: bf16[2,4,240], index: 0, kind: input, shape index: {}]   ;;  %s357_s1 = inlined_call_operand.vmem [shape: f32[4,1], index: 1, kind: input, shape index: {}]   ;;  %s358_s2 = inlined_call_operand.vmem [shape: f32[4,1], index: 2, kind: input, shape index: {}]   ;;  %s359_s3 = inlined_call_operand.vmem [shape: bf16[2,4,240], index: 3, kind: output, shape index: {}]  }
   0x1 LB: > { %s276_s13 = sadd.s32 4294967295, %s308_s12   ;;  %p280_p0 = scmp.ge.s32.totalorder %s308_s12, 1  ;;  %s308_s12 = sphi %s333_s12, %s13_s12  }
   0x2   : > { %p137_p1 = scmp.lt.s32.totalorder %s308_s12, 3 }
   0x4   : > { %p138_p2 = pnand %p280_p0, %p137_p1 }
   0x5   : > { %v173_v0 = vld [vmem:[%s357_s1] sm:$0xf] (!%p138_p2)  ;;  %v310_v1 = vmov (!%p138_p2), 0   ;;  %p161_p3 = scmp.lt.s32.totalorder (!%p138_p2), %s276_s13, 1  ;;  %v311_v3 = vmov (!%p138_p2), 839922192   ;;  %v181_v5 = vlaneseq (!%p138_p2) }
   0x6   : > { %141 = sbr.rel (%p138_p2) target bundleno = 150 (0x96), region = 32  ;;  %301 = vset.pattern.permute.xlu0 (!%p138_p2), %v310_v1  ;;  %v187_v2 = vld [vmem:[%s358_s2] sm:$0xf] (!%p138_p2)  ;;  %v179_v4 = vunpack.c.l.s4 (!%p138_p2), %v311_v3  ;;  %v312_v11 = vmov (!%p138_p2), 1983009808   ;;  %vm217_vm0 = vcmask (!%p138_p2), 1041408  }
   0x7   : > { %176 = vperm.xlu0 (!%p138_p2), %301, %v173_v0   ;;  %v182_v7 = vshrl.u32 (!%p138_p2), %v181_v5, 7  ;;  %v210_v12 = vunpack.c.l.s4 (!%p138_p2), %v312_v11  ;;  %vm218_vm1 = vcmask (!%p138_p2), 912386  }
   0x8   : > { %v180_v6 = vunpack.c.0.s8 (!%p138_p2), %v179_v4  ;;  %vm219_vm2 = vmor (!%p138_p2), %vm218_vm1, %vm217_vm0 }
   0x9   : > { %v211_v16 = vunpack.c.0.s8 (!%p138_p2), %v210_v12 }
   0xa   : > { %v183_v8 = vsub.s32 (!%p138_p2), %v180_v6, %v182_v7 }
   0xb   : > { %190 = vperm.xlu0 (!%p138_p2), %301, %v187_v2   ;;  %v214_v20 = vsub.s32 (!%p138_p2), %v211_v16, %v182_v7 }
   0xd   : > { %s361_s13 = smov (!%p161_p3, %s276_s13), 1 }
   0xe   : > { %s288_s18 = sshll.u32 %s361_s13, 2 }
   0xf   : > { %s165_s21 = scalar_lea.vmem %s356_s0, %s288_s18  ;;  %s170_s24 = scalar_lea.vmem %s359_s3, %s288_s18 }
  0x10   : > { %v171_v9 = vld [vmem:[%s165_s21] sm:$0xf] }
  0x11   : > { %v172_v13 = vunpack.c.l.bf16 %v171_v9 }
  0x86   : > { %v177_v10 = vpop.permute.xlu0 %176 }
  0x87   : > { %v184_v14 = vrot.slane %v177_v10, %v183_v8 }
  0x89   : > { %v186_v17 = vmul.f32 %v184_v14, %v172_v13 }
  0x8a   : > { %v191_v15 = vpop.permute.xlu0 %190 }
  0x8b   : > { %v198_v18 = vrot.slane %v191_v15, %v183_v8 }
  0x8d   : > { %v200_v19 = vadd.f32 %v198_v18, %v186_v17 }
  0x8f   : > { %v202_v21 = vcombine.high %v200_v19, %v200_v19 }
  0x91   : > { %v285_v22 = vpack.c.bf16 %v202_v21, %v200_v19 }
  0x93   : > { %v215_v23 = vrot.slane %v285_v22, %v214_v20 }
  0x95   : > { %220 = vst.msk [vmem:[%s170_s24] sm:$0xf] %vm219_vm2, %v215_v23 }
  0x96 PF: > { %s13_s12 = sadd.s32 1, %s308_s12  }
  0x97   : > { %p10_p4 = scmp.ge.s32.totalorder %s13_s12, 4  }
  0x99   :  { %12 = sbr.rel (!%p10_p4) target bundleno = 1 (0x1), region = 62 }

// kernel: up_forward.5
= control target key start
LH: loop header
LB: loop body
LE: loop exit
PB: predicated region body
PF: predicated region fallthrough
CT: control target
= control target key end

     0   :  { %s776_s18 = smov 0   ;;  %s834_s0 = inlined_call_operand.vmem [shape: bf16[2,8,257], index: 0, kind: input, shape index: {}]   ;;  %s835_s1 = inlined_call_operand.vmem [shape: bf16[4,4,8], index: 1, kind: input, shape index: {}]   ;;  %s836_s2 = inlined_call_operand.vmem [shape: f32[4,1], index: 2, kind: input, shape index: {}]   ;;  %s837_s3 = inlined_call_operand.vmem [shape: bf16[2,4,240], index: 3, kind: output, shape index: {0}]   ;;  %s838_s4 = inlined_call_operand.vmem [shape: f32[2,4,1], index: 4, kind: output, shape index: {1}]   ;;  %s839_s5 = inlined_call_operand.vmem [shape: f32[2,4,1], index: 5, kind: output, shape index: {2}]  }
   0x1 LB: > { %s686_s19 = sadd.s32 4294967295, %s739_s18   ;;  %p690_p0 = scmp.ge.s32.totalorder %s739_s18, 1  ;;  %s739_s18 = sphi %s776_s18, %s16_s18  }
   0x2   : > { %p192_p1 = scmp.lt.s32.totalorder %s739_s18, 3 }
   0x4   : > { %p193_p2 = pnand %p690_p0, %p192_p1 }
   0x5   : > { %p228_p3 = scmp.lt.s32.totalorder (!%p193_p2), %s686_s19, 1  ;;  %v741_v0 = vmov (!%p193_p2), 0   ;;  %vm267_vm0 = vcmask (!%p193_p2), 1043456   ;;  %s742_s24 = smov (!%p193_p2), 112   ;;  %vm263_vm1 = vcmask (!%p193_p2), 64512   ;;  %vm261_vm2 = vcmask (!%p193_p2), 1039360  }
   0x6   : > { %196 = sbr.rel (%p193_p2) target bundleno = 522 (0x20a), region = 32  ;;  %306 = vmatprep.mubr.bf16.mxu0 (!%p193_p2), %v741_v0  ;;  %356 = vmatprep.mubr.bf16.mxu1 (!%p193_p2), %v741_v0  ;;  %s743_s25 = smov (!%p193_p2), 127   ;;  %v249_v5 = vld [vmem:[%s835_s1] sm:$0x3] (!%p193_p2)  ;;  %vm371_vm3 = vcmask (!%p193_p2), 916480   ;;  %vm436_vm4 = vcmask (!%p193_p2), 908288   ;;  %v509_v29 = vlaneseq (!%p193_p2) }
   0x7   : > { %728 = vset.pattern.permute.xlu1 (!%p193_p2), %v741_v0  ;;  %729 = vset.pattern.permute.xlu0 (!%p193_p2), %v741_v0  ;;  %s744_s28 = smov (!%p193_p2), 111   ;;  %v491_v7 = vld [vmem:[%s836_s2] sm:$0xf] (!%p193_p2)  ;;  %v703_v23 = vld [vmem:[%s835_s1 + $0x4] sm:$0x3] (!%p193_p2)  ;;  %vm554_vm7 = vcmask (!%p193_p2), 912384  }
   0x8   : > { %v696_v15 = vld [vmem:[%s835_s1 + $0x2] sm:$0x3] (!%p193_p2)  ;;  %v706_v24 = vld [vmem:[%s835_s1 + $0x6] sm:$0x3] (!%p193_p2)  ;;  %v519_v36 = vand.u32 (!%p193_p2), 127, %v509_v29  ;;  %v510_v53 = vshrl.u32 (!%p193_p2), %v509_v29, 7 }
   0x9   : > { %v745_v37 = vmov (!%p193_p2), 1983009808   ;;  %vm514_vm8 = vcmask (!%p193_p2), 1041408   ;;  %vm515_vm9 = vcmask (!%p193_p2), 912386   ;;  %vm559_vm11 = vcmask (!%p193_p2), 3072  }
   0xa   : > { %v507_v38 = vunpack.c.l.s4 (!%p193_p2), %v745_v37  ;;  %v520_v40 = vadd.s32 (!%p193_p2), 128, %v519_v36  ;;  %v525_v49 = vand.u32 (!%p193_p2), 15, %v519_v36  ;;  %vm516_vm10 = vmor (!%p193_p2), %vm515_vm9, %vm514_vm8 }
   0xc   : > { %v508_v52 = vunpack.c.0.s8 (!%p193_p2), %v507_v38  ;;  %v532_v55 = vand.u32 (!%p193_p2), 15, %v520_v40  ;;  %vm545_vm5 = vcmp.lt.s32.totalorder (!%p193_p2), %v525_v49, 15 }
   0xd   : > { %s841_s19 = smov (!%p228_p3, %s686_s19), 1 }
   0xe   : > { %s714_s20 = smul.u32 12, %s841_s19  ;;  %v511_v59 = vsub.s32 %v508_v52, %v510_v53  ;;  %vm546_vm6 = vcmp.lt.s32.totalorder %v532_v55, 15  ;;  %s713_s12 = sshll.u32 %s841_s19, 2 }
   0xf   : > { %s237_s15 = scalar_lea.vmem %s837_s3, %s713_s12  ;;  %s241_s19 = scalar_lea.vmem %s838_s4, %s713_s12 }
  0x10   : > { %s232_s23 = scalar_lea.vmem %s834_s0, %s714_s20  ;;  %s245_s22 = scalar_lea.vmem %s839_s5, %s713_s12 }
  0x11   : > { %v247_v1 = vld [vmem:[%s232_s23] sm:$0xff]  ;;  %v732_v6 = vld [vmem:[%s232_s23 + $0x8] ss:$0 sps:$4 sm:$0xff]  }
  0x12   : > { %v697_v2 = vcombine.low %v247_v1, %v247_v1  ;;  %v698_v3 = vcombine.high %v247_v1, %v247_v1 }
  0x14   : > { %367 = vrot.lane.b32.xlu1 %v697_v2, %s742_s24  ;;  %257 = vrot.lane.b32.xlu0 %v697_v2, %s743_s25  ;;  %v319_v4 = vsel %vm267_vm0, %v697_v2, 0 }
  0x15   : > { %701 = vmatprep.subr.msk.bf16.mxu1 %vm267_vm0, %v698_v3 }
  0x16   : > { %325 = vmatpush1.bf16.msra.mxu1 %v319_v4 }
  0x18   : > { %369 = vrot.lane.b32.xlu1 %v698_v3, %s742_s24  ;;  %259 = vrot.lane.b32.xlu0 %v698_v3, %s743_s25 }
  0x19   : > { %702 = vmatmul.mubr.msk.bf16.vlgmr.msra.gmra.mrb[0].mxu1 %vm263_vm1, %v249_v5 }
  0x1a   : > { %480 = vmatprep.mubr.bf16.mxu1 %v741_v0 }
  0x1c   : > { %432 = vrot.lane.b32.xlu1 %v698_v3, %s744_s28  ;;  %430 = vrot.lane.b32.xlu0 %v697_v2, %s744_s28 }
  0x20   : > { %434 = vrot.lane.b32.xlu0 %v732_v6, %s744_s28  ;;  %494 = vperm.xlu1 %728, %v491_v7  }
  0x86   : > { %v368_v8 = vpop.permute.xlu1 %367  ;;  %v258_v9 = vpop.permute.xlu0 %257 }
  0x8a   : > { %v370_v10 = vpop.permute.xlu1 %369  ;;  %v260_v11 = vpop.permute.xlu0 %259 }
  0x8b   : > { %699 = vmatprep.subr.msk.bf16.mxu0 %vm267_vm0, %v260_v11  ;;  %v262_v12 = vsel %vm261_vm2, %v258_v9, %v260_v11  ;;  %v372_v14 = vsel %vm371_vm3, %v368_v8, %v370_v10 }
  0x8c   : > { %v269_v13 = vsel %vm267_vm0, %v262_v12, 0  ;;  %v377_v18 = vsel %vm267_vm0, %v372_v14, 0 }
  0x8d   : > { %275 = vmatpush1.bf16.msra.mxu0 %v269_v13 }
  0x8e   : > { %v433_v16 = vpop.permute.xlu1 %432  ;;  %v431_v17 = vpop.permute.xlu0 %430  ;;  %704 = vmatprep.subr.msk.bf16.mxu0 %vm267_vm0, %v370_v10 }
  0x8f   : > { %v437_v19 = vsel %vm436_vm4, %v431_v17, %v433_v16 }
  0x90   : > { %700 = vmatmul.mubr.msk.bf16.vlgmr.msra.gmra.mrb[0].mxu0 %vm263_vm1, %v696_v15  ;;  %v443_v22 = vsel %vm267_vm0, %v437_v19, 0 }
  0x91   : > { %383 = vmatpush1.bf16.msra.mxu0 %v377_v18  ;;  %414 = vmatprep.mubr.bf16.mxu0 %v741_v0 }
  0x92   : > { %v435_v20 = vpop.permute.xlu0 %434 }
  0x93   : > { %v438_v21 = vsel %vm436_vm4, %v433_v16, %v435_v20 }
  0x94   : > { %708 = vmatprep.subr.msk.bf16.mxu1 %vm267_vm0, %v438_v21 }
  0x95   : > { %449 = vmatpush1.bf16.msra.mxu1 %v443_v22 }
  0x98   : > { %705 = vmatmul.mubr.msk.bf16.vlgmr.msra.gmra.mrb[4].mxu0 %vm263_vm1, %v703_v23  ;;  %709 = vmatmul.mubr.msk.bf16.vlgmr.msra.gmra.mrb[4].mxu1 %vm263_vm1, %v706_v24 }
  0x9f   : > { %v495_v39 = vpop.permute.xlu1 %494 }
  0xec   : > { %v358_v25 = vpop.f32.mrb[0].mxu1 }
  0xed   : > { %v360_v26 = vpop.f32.mrb[1].mxu1 }
  0xee   : > { %v362_v27 = vpop.f32.mrb[2].mxu1 }
  0xef   : > { %v363_v28 = vpop.f32.mrb[3].mxu1 }
 0x163   : > { %v308_v30 = vpop.f32.mrb[0].mxu0 }
 0x164   : > { %v310_v31 = vpop.f32.mrb[1].mxu0  ;;  %v359_v32 = vadd.f32 %v358_v25, %v308_v30 }
 0x165   : > { %v312_v33 = vpop.f32.mrb[2].mxu0  ;;  %v361_v34 = vadd.f32 %v360_v26, %v310_v31 }
 0x166   : > { %v313_v35 = vpop.f32.mrb[3].mxu0 }
 0x16b   : > { %v416_v41 = vpop.f32.mrb[4].mxu0  ;;  %v482_v42 = vpop.f32.mrb[4].mxu1 }
 0x16c   : > { %v423_v43 = vadd.f32 %v416_v41, %v359_v32  ;;  %v418_v44 = vpop.f32.mrb[5].mxu0  ;;  %v484_v45 = vpop.f32.mrb[5].mxu1 }
 0x16d   : > { %v424_v46 = vadd.f32 %v418_v44, %v361_v34  ;;  %v420_v47 = vpop.f32.mrb[6].mxu0  ;;  %v486_v48 = vpop.f32.mrb[6].mxu1 }
 0x16e   : > { %v489_v50 = vadd.f32 %v482_v42, %v423_v43  ;;  %v421_v51 = vpop.f32.mrb[7].mxu0  ;;  %v487_v54 = vpop.f32.mrb[7].mxu1 }
 0x16f   : > { %v490_v56 = vadd.f32 %v484_v45, %v424_v46 }
 0x170   : > { %v497_v57 = vadd.f32 %v495_v39, %v489_v50 }
 0x171   : > { %v498_v58 = vadd.f32 %v495_v39, %v490_v56 }
 0x172   : > { %v499_v60 = vmax.f32 %v497_v57, 0.0 }
 0x173   : > { %v500_v61 = vmax.f32 %v498_v58, 0.0 }
 0x174   : > { %v551_v62 = vsel %vm545_vm5, %v499_v60, 0.0 }
 0x175   : > { %v710_v63 = vpack.c.bf16 %v500_v61, %v499_v60  ;;  %v552_v0 = vsel %vm546_vm6, %v500_v61, 0.0  ;;  %v553_v1 = vsel %vm267_vm0, %v551_v62, 0.0  ;;  %v561_v2 = vmul.f32 %v551_v62, %v551_v62 }
 0x176   : > { %v555_v3 = vsel %vm554_vm7, %v552_v0, 0.0  ;;  %v562_v4 = vmul.f32 %v552_v0, %v552_v0 }
 0x177   : > { %v512_v5 = vrot.slane %v710_v63, %v511_v59  ;;  %v556_v6 = vadd.f32 %v555_v3, %v553_v1  ;;  %v563_v7 = vsel %vm267_vm0, %v561_v2, 0.0 }
 0x178   : > { %v564_v8 = vsel %vm554_vm7, %v562_v4, 0.0 }
 0x179   : > { %557 = vadd.xlane.f32.xlu0 %v556_v6  ;;  %v565_v9 = vadd.f32 %v564_v8, %v563_v7  ;;  %517 = vst.msk [vmem:[%s237_s15] sm:$0xf] %vm516_vm10, %v512_v5 }
 0x17b   : > { %566 = vadd.xlane.f32.xlu1 %v565_v9 }
 0x206   : > { %v558_v10 = vpop.xlane.xlu0 %557 }
 0x207   : > { %560 = vst.msk [vmem:[%s241_s19] sm:$0xf] %vm559_vm11, %v558_v10 }
 0x208   : > { %v567_v11 = vpop.xlane.xlu1 %566 }
 0x209   : > { %568 = vst.msk [vmem:[%s245_s22] sm:$0xf] %vm559_vm11, %v567_v11 }
 0x20a PF: > { %s16_s18 = sadd.s32 1, %s739_s18  }
 0x20b   : > { %p13_p4 = scmp.ge.s32.totalorder %s16_s18, 4  }
 0x20d   :  { %15 = sbr.rel (!%p13_p4) target bundleno = 1 (0x1), region = 89 }

// kernel: up_forward.7
= control target key start
LH: loop header
LB: loop body
LE: loop exit
PB: predicated region body
PF: predicated region fallthrough
CT: control target
= control target key end

     0   :  { %s1413_s12 = smov 0   ;;  %s1548_s0 = inlined_call_operand.vmem [shape: bf16[2,8,326], index: 0, kind: input, shape index: {}]   ;;  %s1549_s1 = inlined_call_operand.vmem [shape: bf16[9,4,8], index: 1, kind: input, shape index: {}]   ;;  %s1550_s2 = inlined_call_operand.vmem [shape: f32[4,1], index: 2, kind: input, shape index: {}]   ;;  %s1551_s3 = inlined_call_operand.vmem [shape: bf16[2,4,288], index: 3, kind: output, shape index: {}]  }
   0x1 LB: > { %s1227_s13 = sadd.s32 4294967295, %s1379_s12   ;;  %p1231_p0 = scmp.ge.s32.totalorder %s1379_s12, 1  ;;  %s1379_s12 = sphi %s1413_s12, %s13_s12  }
   0x2   : > { %p137_p1 = scmp.lt.s32.totalorder %s1379_s12, 3 }
   0x4   : > { %p138_p2 = pnand %p1231_p0, %p137_p1 }
   0x5   : > { %p161_p3 = scmp.lt.s32.totalorder (!%p138_p2), %s1227_s13, 1  ;;  %v1381_v0 = vmov (!%p138_p2), 0.0   ;;  %vm1382_vm0 = vmmov (!%p138_p2), 0   ;;  %v1383_v1 = vmov (!%p138_p2), 0   ;;  %s1384_s18 = smov (!%p138_p2), 127   ;;  %vm198_vm1 = vcmask (!%p138_p2), 1043456  }
   0x6   : > { %141 = sbr.rel (%p138_p2) target bundleno = 434 (0x1b2), region = 32  ;;  %1293 = vmatprep.subr.bf16.mxu1 (!%p138_p2), %v1381_v0  ;;  %1295 = vmatprep.mubr.msk.bf16.mxu1 (!%p138_p2), %vm1382_vm0, %v1381_v0  ;;  %s1385_s19 = smov (!%p138_p2), 126   ;;  %v1131_v6 = vld [vmem:[%s1550_s2] sm:$0xf] (!%p138_p2)  ;;  %vm194_vm2 = vcmask (!%p138_p2), 64512   ;;  %vm191_vm3 = vcmask (!%p138_p2), 1039360  }
   0x7   : > { %240 = vmatprep.mubr.bf16.mxu0 (!%p138_p2), %v1383_v1  ;;  %1369 = vset.pattern.permute.xlu0 (!%p138_p2), %v1383_v1  ;;  %s1386_s20 = smov (!%p138_p2), 110   ;;  %s1387_s21 = smov (!%p138_p2), 109   ;;  %v1234_v10 = vld [vmem:[%s1549_s1 + $0x2] sm:$0x3] (!%p138_p2)  ;;  %vm390_vm4 = vcmask (!%p138_p2), 1031168   ;;  %vm497_vm5 = vcmask (!%p138_p2), 900096  }
   0x8   : > { %s1388_s22 = smov (!%p138_p2), 108   ;;  %s1389_s23 = smov (!%p138_p2), 92   ;;  %v174_v20 = vld [vmem:[%s1549_s1] sm:$0x3] (!%p138_p2)  ;;  %v1244_v29 = vld [vmem:[%s1549_s1 + $0x4] sm:$0x3] (!%p138_p2) }
   0x9   : > { %s1390_s24 = smov (!%p138_p2), 91   ;;  %s1391_s25 = smov (!%p138_p2), 90   ;;  %vm604_vm6 = vcmask (!%p138_p2), 891904   ;;  %v1248_v37 = vld [vmem:[%s1549_s1 + $0x6] sm:$0x3] (!%p138_p2)  ;;  %vm711_vm7 = vcmask (!%p138_p2), 883712  }
   0xa   : > { %v1252_v45 = vld [vmem:[%s1549_s1 + $0x8] sm:$0x3] (!%p138_p2)  ;;  %vm818_vm8 = vcmask (!%p138_p2), 752640   ;;  %v1256_v53 = vld [vmem:[%s1549_s1 + $0xa] sm:$0x3] (!%p138_p2)  ;;  %vm925_vm9 = vcmask (!%p138_p2), 744448  }
   0xb   : > { %v1260_v61 = vld [vmem:[%s1549_s1 + $0xc] sm:$0x3] (!%p138_p2)  ;;  %vm1032_vm10 = vcmask (!%p138_p2), 736256   ;;  %vm1166_vm11 = vcmask (!%p138_p2), 1041408   ;;  %vm1167_vm12 = vcmask (!%p138_p2), 1043458   ;;  %vm1169_vm14 = vcmask (!%p138_p2), 259076  }
   0xc   : > { %vm1168_vm13 = vmor (!%p138_p2), %vm1167_vm12, %vm1166_vm11 }
   0xd   : > { %s1553_s13 = smov (!%p161_p3, %s1227_s13), 1  ;;  %vm1170_vm15 = vmor %vm1169_vm14, %vm1168_vm13 }
   0xe   : > { %s1347_s14 = smul.u32 12, %s1553_s13 }
  0x10   : > { %s165_s17 = scalar_lea.vmem %s1548_s0, %s1347_s14 }
  0x11   : > { %v1370_v2 = vld [vmem:[%s165_s17 + $0x8] ss:$0 sps:$4 sm:$0xff]   ;;  %v172_v3 = vld [vmem:[%s165_s17] sm:$0xff] }
  0x12   : > { %v1235_v4 = vcombine.low %v172_v3, %v172_v3  ;;  %189 = vrot.lane.b32.xlu1 %v1370_v2, %s1384_s18  ;;  %v1236_v5 = vcombine.high %v172_v3, %v172_v3  ;;  %v299_v11 = vsel %vm198_vm1, %v1370_v2, 0 }
  0x14   : > { %185 = vrot.lane.b32.xlu0 %v1235_v4, %s1384_s18  ;;  %v293_v18 = vsel %vm198_vm1, %v1235_v4, 0 }
  0x16   : > { %384 = vrot.lane.b32.xlu1 %v1235_v4, %s1385_s19 }
  0x18   : > { %187 = vrot.lane.b32.xlu0 %v1236_v5, %s1384_s18 }
  0x1a   : > { %388 = vrot.lane.b32.xlu1 %v1370_v2, %s1385_s19 }
  0x1c   : > { %386 = vrot.lane.b32.xlu0 %v1236_v5, %s1385_s19 }
  0x1e   : > { %493 = vrot.lane.b32.xlu1 %v1236_v5, %s1386_s20 }
  0x20   : > { %491 = vrot.lane.b32.xlu0 %v1235_v4, %s1386_s20 }
  0x22   : > { %598 = vrot.lane.b32.xlu1 %v1235_v4, %s1387_s21 }
  0x24   : > { %495 = vrot.lane.b32.xlu0 %v1370_v2, %s1386_s20 }
  0x26   : > { %602 = vrot.lane.b32.xlu1 %v1370_v2, %s1387_s21 }
  0x28   : > { %600 = vrot.lane.b32.xlu0 %v1236_v5, %s1387_s21  ;;  %s1348_s21 = smul.u32 6, %s1553_s13 }
  0x2a   : > { %707 = vrot.lane.b32.xlu1 %v1236_v5, %s1388_s22 }
  0x2c   : > { %705 = vrot.lane.b32.xlu0 %v1235_v4, %s1388_s22 }
  0x2e   : > { %812 = vrot.lane.b32.xlu1 %v1235_v4, %s1389_s23 }
  0x30   : > { %709 = vrot.lane.b32.xlu0 %v1370_v2, %s1388_s22 }
  0x32   : > { %816 = vrot.lane.b32.xlu1 %v1370_v2, %s1389_s23 }
  0x34   : > { %814 = vrot.lane.b32.xlu0 %v1236_v5, %s1389_s23 }
  0x36   : > { %921 = vrot.lane.b32.xlu1 %v1236_v5, %s1390_s24 }
  0x38   : > { %919 = vrot.lane.b32.xlu0 %v1235_v4, %s1390_s24 }
  0x3a   : > { %1026 = vrot.lane.b32.xlu1 %v1235_v4, %s1391_s25 }
  0x3c   : > { %923 = vrot.lane.b32.xlu0 %v1370_v2, %s1390_s24  ;;  %s170_s24 = scalar_lea.vmem %s1551_s3, %s1348_s21 }
  0x3e   : > { %1030 = vrot.lane.b32.xlu1 %v1370_v2, %s1391_s25 }
  0x40   : > { %1028 = vrot.lane.b32.xlu0 %v1236_v5, %s1391_s25 }
  0x44   : > { %1134 = vperm.xlu0 %1369, %v1131_v6   ;;  %v1264_v6 = vld [vmem:[%s1549_s1 + $0xe] sm:$0x3] }
  0x84   : > { %v190_v7 = vpop.permute.xlu1 %189 }
  0x85   : > { %v206_v9 = vsel %vm198_vm1, %v190_v7, 0 }
  0x86   : > { %v186_v8 = vpop.permute.xlu0 %185  ;;  %1294 = vmatpush3.bf16.msra.mxu1 %v206_v9 }
  0x87   : > { %1299 = vmatprep.subr.bf16.mxu1 %v1381_v0 }
  0x88   : > { %v385_v12 = vpop.permute.xlu1 %384 }
  0x89   : > { %1296 = vmatmul.mubr.msk.bf16.vlgmr.msra.gmra.mrb[0].mxu1 %vm194_vm2, %v1234_v10 }
  0x8a   : > { %v188_v13 = vpop.permute.xlu0 %187  ;;  %1300 = vmatpush3.bf16.msra.mxu1 %v299_v11  ;;  %1301 = vmatprep.mubr.msk.bf16.mxu1 %vm1382_vm0, %v1381_v0  ;;  %v1268_v11 = vld [vmem:[%s1549_s1 + $0x10] sm:$0x3] }
  0x8b   : > { %v193_v14 = vsel %vm191_vm3, %v188_v13, %v190_v7  ;;  %v192_v15 = vsel %vm191_vm3, %v186_v8, %v188_v13  ;;  %1305 = vmatprep.subr.bf16.mxu1 %v1381_v0 }
  0x8c   : > { %1238 = vmatprep.subr.msk.bf16.mxu0 %vm198_vm1, %v193_v14  ;;  %v200_v16 = vsel %vm198_vm1, %v192_v15, 0  ;;  %v389_v17 = vpop.permute.xlu1 %388 }
  0x8d   : > { %209 = vmatpush1.bf16.msra.mxu0 %v200_v16  ;;  %v403_v22 = vsel %vm198_vm1, %v389_v17, 0 }
  0x8e   : > { %1241 = vmatprep.subr.msk.bf16.mxu0 %vm198_vm1, %v1236_v5  ;;  %v387_v19 = vpop.permute.xlu0 %386 }
  0x8f   : > { %v392_v21 = vsel %vm390_vm4, %v387_v19, %v389_v17  ;;  %v391_v25 = vsel %vm390_vm4, %v385_v12, %v387_v19 }
  0x90   : > { %1239 = vmatmul.mubr.msk.bf16.vlgmr.msra.gmra.mrb[0].mxu0 %vm194_vm2, %v1234_v10  ;;  %v494_v23 = vpop.permute.xlu1 %493  ;;  %v397_v26 = vsel %vm198_vm1, %v391_v25, 0 }
  0x91   : > { %302 = vmatpush1.bf16.msra.mxu0 %v293_v18  ;;  %333 = vmatprep.mubr.bf16.mxu0 %v1383_v1 }
  0x92   : > { %1302 = vmatmul.mubr.msk.bf16.vlgmr.msra.gmra.mrb[4].mxu1 %vm194_vm2, %v174_v20  ;;  %1245 = vmatprep.subr.msk.bf16.mxu0 %vm198_vm1, %v392_v21  ;;  %v492_v24 = vpop.permute.xlu0 %491 }
  0x93   : > { %1306 = vmatpush3.bf16.msra.mxu1 %v403_v22  ;;  %1307 = vmatprep.mubr.msk.bf16.mxu1 %vm1382_vm0, %v1381_v0  ;;  %v498_v33 = vsel %vm497_vm5, %v492_v24, %v494_v23 }
  0x94   : > { %1311 = vmatprep.subr.bf16.mxu1 %v1381_v0  ;;  %v599_v28 = vpop.permute.xlu1 %598  ;;  %v504_v35 = vsel %vm198_vm1, %v498_v33, 0 }
  0x96   : > { %v496_v27 = vpop.permute.xlu0 %495 }
  0x97   : > { %v499_v30 = vsel %vm497_vm5, %v494_v23, %v496_v27  ;;  %v510_v31 = vsel %vm198_vm1, %v496_v27, 0 }
  0x98   : > { %1242 = vmatmul.mubr.msk.bf16.vlgmr.msra.gmra.mrb[4].mxu0 %vm194_vm2, %v174_v20  ;;  %v603_v34 = vpop.permute.xlu1 %602 }
  0x99   : > { %406 = vmatpush1.bf16.msra.mxu0 %v397_v26  ;;  %437 = vmatprep.mubr.bf16.mxu0 %v1383_v1  ;;  %v617_v39 = vsel %vm198_vm1, %v603_v34, 0 }
  0x9a   : > { %1308 = vmatmul.mubr.msk.bf16.vlgmr.msra.gmra.mrb[8].mxu1 %vm194_vm2, %v1244_v29  ;;  %1249 = vmatprep.subr.msk.bf16.mxu0 %vm198_vm1, %v499_v30  ;;  %v601_v32 = vpop.permute.xlu0 %600 }
  0x9b   : > { %1312 = vmatpush3.bf16.msra.mxu1 %v510_v31  ;;  %1313 = vmatprep.mubr.msk.bf16.mxu1 %vm1382_vm0, %v1381_v0  ;;  %v606_v38 = vsel %vm604_vm6, %v601_v32, %v603_v34  ;;  %v605_v41 = vsel %vm604_vm6, %v599_v28, %v601_v32 }
  0x9c   : > { %1317 = vmatprep.subr.bf16.mxu1 %v1381_v0  ;;  %v708_v40 = vpop.permute.xlu1 %707  ;;  %v611_v43 = vsel %vm198_vm1, %v605_v41, 0 }
  0x9e   : > { %v706_v36 = vpop.permute.xlu0 %705 }
  0x9f   : > { %v712_v49 = vsel %vm711_vm7, %v706_v36, %v708_v40 }
  0xa0   : > { %1246 = vmatmul.mubr.msk.bf16.vlgmr.msra.gmra.mrb[8].mxu0 %vm194_vm2, %v1244_v29  ;;  %v813_v44 = vpop.permute.xlu1 %812  ;;  %v718_v51 = vsel %vm198_vm1, %v712_v49, 0 }
  0xa1   : > { %513 = vmatpush1.bf16.msra.mxu0 %v504_v35  ;;  %544 = vmatprep.mubr.bf16.mxu0 %v1383_v1 }
  0xa2   : > { %1314 = vmatmul.mubr.msk.bf16.vlgmr.msra.gmra.mrb[12].mxu1 %vm194_vm2, %v1248_v37  ;;  %1253 = vmatprep.subr.msk.bf16.mxu0 %vm198_vm1, %v606_v38  ;;  %v710_v42 = vpop.permute.xlu0 %709 }
  0xa3   : > { %1318 = vmatpush3.bf16.msra.mxu1 %v617_v39  ;;  %1319 = vmatprep.mubr.msk.bf16.mxu1 %vm1382_vm0, %v1381_v0  ;;  %v713_v46 = vsel %vm711_vm7, %v708_v40, %v710_v42  ;;  %v724_v47 = vsel %vm198_vm1, %v710_v42, 0 }
  0xa4   : > { %1323 = vmatprep.subr.bf16.mxu1 %v1381_v0  ;;  %v817_v50 = vpop.permute.xlu1 %816 }
  0xa5   : > { %v831_v55 = vsel %vm198_vm1, %v817_v50, 0 }
  0xa6   : > { %v815_v48 = vpop.permute.xlu0 %814 }
  0xa7   : > { %v820_v54 = vsel %vm818_vm8, %v815_v48, %v817_v50  ;;  %v819_v57 = vsel %vm818_vm8, %v813_v44, %v815_v48 }
  0xa8   : > { %1250 = vmatmul.mubr.msk.bf16.vlgmr.msra.gmra.mrb[12].mxu0 %vm194_vm2, %v1248_v37  ;;  %v922_v56 = vpop.permute.xlu1 %921  ;;  %v825_v59 = vsel %vm198_vm1, %v819_v57, 0 }
  0xa9   : > { %620 = vmatpush1.bf16.msra.mxu0 %v611_v43  ;;  %651 = vmatprep.mubr.bf16.mxu0 %v1383_v1 }
  0xaa   : > { %1320 = vmatmul.mubr.msk.bf16.vlgmr.msra.gmra.mrb[16].mxu1 %vm194_vm2, %v1252_v45  ;;  %1257 = vmatprep.subr.msk.bf16.mxu0 %vm198_vm1, %v713_v46  ;;  %v920_v52 = vpop.permute.xlu0 %919 }
  0xab   : > { %1324 = vmatpush3.bf16.msra.mxu1 %v724_v47  ;;  %1325 = vmatprep.mubr.msk.bf16.mxu1 %vm1382_vm0, %v1381_v0  ;;  %v926_v2 = vsel %vm925_vm9, %v920_v52, %v922_v56 }
  0xac   : > { %1329 = vmatprep.subr.bf16.mxu1 %v1381_v0  ;;  %v1027_v60 = vpop.permute.xlu1 %1026  ;;  %v932_v5 = vsel %vm198_vm1, %v926_v2, 0 }
  0xae   : > { %v924_v58 = vpop.permute.xlu0 %923 }
  0xaf   : > { %v927_v62 = vsel %vm925_vm9, %v922_v56, %v924_v58  ;;  %v938_v63 = vsel %vm198_vm1, %v924_v58, 0 }
  0xb0   : > { %1254 = vmatmul.mubr.msk.bf16.vlgmr.msra.gmra.mrb[16].mxu0 %vm194_vm2, %v1252_v45  ;;  %v1031_v4 = vpop.permute.xlu1 %1030 }
  0xb1   : > { %727 = vmatpush1.bf16.msra.mxu0 %v718_v51  ;;  %758 = vmatprep.mubr.bf16.mxu0 %v1383_v1  ;;  %v1045_v8 = vsel %vm198_vm1, %v1031_v4, 0 }
  0xb2   : > { %1326 = vmatmul.mubr.msk.bf16.vlgmr.msra.gmra.mrb[20].mxu1 %vm194_vm2, %v1256_v53  ;;  %1261 = vmatprep.subr.msk.bf16.mxu0 %vm198_vm1, %v820_v54  ;;  %v1029_v3 = vpop.permute.xlu0 %1028 }
  0xb3   : > { %1330 = vmatpush3.bf16.msra.mxu1 %v831_v55  ;;  %1331 = vmatprep.mubr.msk.bf16.mxu1 %vm1382_vm0, %v1381_v0  ;;  %v1034_v7 = vsel %vm1032_vm10, %v1029_v3, %v1031_v4  ;;  %v1033_v9 = vsel %vm1032_vm10, %v1027_v60, %v1029_v3 }
  0xb4   : > { %1335 = vmatprep.subr.bf16.mxu1 %v1381_v0  ;;  %v1039_v10 = vsel %vm198_vm1, %v1033_v9, 0 }
  0xb8   : > { %1258 = vmatmul.mubr.msk.bf16.vlgmr.msra.gmra.mrb[20].mxu0 %vm194_vm2, %v1256_v53 }
  0xb9   : > { %834 = vmatpush1.bf16.msra.mxu0 %v825_v59  ;;  %865 = vmatprep.mubr.bf16.mxu0 %v1383_v1 }
  0xba   : > { %1332 = vmatmul.mubr.msk.bf16.vlgmr.msra.gmra.mrb[24].mxu1 %vm194_vm2, %v1260_v61  ;;  %1265 = vmatprep.subr.msk.bf16.mxu0 %vm198_vm1, %v927_v62 }
  0xbb   : > { %1336 = vmatpush3.bf16.msra.mxu1 %v938_v63  ;;  %1337 = vmatprep.mubr.msk.bf16.mxu1 %vm1382_vm0, %v1381_v0 }
  0xbc   : > { %1341 = vmatprep.subr.bf16.mxu1 %v1381_v0 }
  0xc0   : > { %1262 = vmatmul.mubr.msk.bf16.vlgmr.msra.gmra.mrb[24].mxu0 %vm194_vm2, %v1260_v61 }
  0xc1   : > { %941 = vmatpush1.bf16.msra.mxu0 %v932_v5  ;;  %972 = vmatprep.mubr.bf16.mxu0 %v1383_v1 }
  0xc2   : > { %1338 = vmatmul.mubr.msk.bf16.vlgmr.msra.gmra.mrb[28].mxu1 %vm194_vm2, %v1264_v6  ;;  %1269 = vmatprep.subr.msk.bf16.mxu0 %vm198_vm1, %v1034_v7 }
  0xc3   : > { %1342 = vmatpush3.bf16.msra.mxu1 %v1045_v8  ;;  %1343 = vmatprep.mubr.msk.bf16.mxu1 %vm1382_vm0, %v1381_v0 }
  0xc8   : > { %1266 = vmatmul.mubr.msk.bf16.vlgmr.msra.gmra.mrb[28].mxu0 %vm194_vm2, %v1264_v6 }
  0xc9   : > { %1048 = vmatpush1.bf16.msra.mxu0 %v1039_v10  ;;  %1079 = vmatprep.mubr.bf16.mxu0 %v1383_v1 }
  0xca   : > { %1344 = vmatmul.mubr.msk.bf16.vlgmr.msra.gmra.mrb[32].mxu1 %vm194_vm2, %v1268_v11 }
  0xd0   : > { %1270 = vmatmul.mubr.msk.bf16.vlgmr.msra.gmra.mrb[32].mxu0 %vm194_vm2, %v1268_v11 }
 0x15c   : > { %v283_v12 = vpop.f32.mrb[0].mxu1 }
 0x15d   : > { %v1297_v13 = vpop.f32.mrb[1].mxu1 }
 0x15e   : > { %v286_v14 = vpop.f32.mrb[2].mxu1 }
 0x15f   : > { %v1298_v15 = vpop.f32.mrb[3].mxu1 }
 0x163   : > { %v242_v0 = vpop.f32.mrb[0].mxu0 }
 0x164   : > { %v244_v16 = vpop.f32.mrb[1].mxu0 }
 0x165   : > { %v246_v17 = vpop.f32.mrb[2].mxu0  ;;  %v376_v18 = vpop.f32.mrb[4].mxu1 }
 0x166   : > { %v247_v19 = vpop.f32.mrb[3].mxu0  ;;  %v377_v20 = vadd.f32 %v376_v18, %v283_v12  ;;  %v1303_v21 = vpop.f32.mrb[5].mxu1 }
 0x167   : > { %v379_v22 = vpop.f32.mrb[6].mxu1 }
 0x168   : > { %v1304_v23 = vpop.f32.mrb[7].mxu1 }
 0x16b   : > { %v335_v24 = vpop.f32.mrb[4].mxu0 }
 0x16c   : > { %v336_v25 = vadd.f32 %v335_v24, %v242_v0  ;;  %v337_v1 = vpop.f32.mrb[5].mxu0 }
 0x16d   : > { %v338_v26 = vadd.f32 %v337_v1, %v244_v16  ;;  %v339_v27 = vpop.f32.mrb[6].mxu0  ;;  %v480_v28 = vpop.f32.mrb[8].mxu1 }
 0x16e   : > { %v340_v29 = vpop.f32.mrb[7].mxu0  ;;  %v488_v30 = vadd.f32 %v480_v28, %v377_v20  ;;  %v1309_v31 = vpop.f32.mrb[9].mxu1 }
 0x16f   : > { %v483_v32 = vpop.f32.mrb[10].mxu1  ;;  %v1135_v28 = vpop.permute.xlu0 %1134 }
 0x170   : > { %v1310_v33 = vpop.f32.mrb[11].mxu1 }
 0x173   : > { %v439_v34 = vpop.f32.mrb[8].mxu0 }
 0x174   : > { %v486_v35 = vadd.f32 %v439_v34, %v336_v25  ;;  %v441_v36 = vpop.f32.mrb[9].mxu0 }
 0x175   : > { %v487_v37 = vadd.f32 %v441_v36, %v338_v26  ;;  %v443_v38 = vpop.f32.mrb[10].mxu0  ;;  %v587_v39 = vpop.f32.mrb[12].mxu1 }
 0x176   : > { %v444_v40 = vpop.f32.mrb[11].mxu0  ;;  %v595_v41 = vadd.f32 %v587_v39, %v488_v30  ;;  %v1315_v42 = vpop.f32.mrb[13].mxu1  ;;  %v1153_v39 = vlaneseq }
 0x177   : > { %v590_v43 = vpop.f32.mrb[14].mxu1 }
 0x178   : > { %v1316_v44 = vpop.f32.mrb[15].mxu1 }
 0x17b   : > { %v546_v45 = vpop.f32.mrb[12].mxu0 }
 0x17c   : > { %v593_v46 = vadd.f32 %v546_v45, %v486_v35  ;;  %v548_v47 = vpop.f32.mrb[13].mxu0  ;;  %v1154_v45 = vshrl.u32 %v1153_v39, 7 }
 0x17d   : > { %v594_v48 = vadd.f32 %v548_v47, %v487_v37  ;;  %v550_v49 = vpop.f32.mrb[14].mxu0  ;;  %v694_v50 = vpop.f32.mrb[16].mxu1  ;;  %v1392_v37 = vmov 1983009808  }
 0x17e   : > { %v551_v51 = vpop.f32.mrb[15].mxu0  ;;  %v702_v52 = vadd.f32 %v694_v50, %v595_v41  ;;  %v1321_v53 = vpop.f32.mrb[17].mxu1  ;;  %v1151_v38 = vunpack.c.l.s4 %v1392_v37 }
 0x17f   : > { %v697_v54 = vpop.f32.mrb[18].mxu1 }
 0x180   : > { %v1322_v55 = vpop.f32.mrb[19].mxu1  ;;  %v1152_v44 = vunpack.c.0.s8 %v1151_v38 }
 0x182   : > { %v1155_v53 = vsub.s32 %v1152_v44, %v1154_v45 }
 0x183   : > { %v653_v56 = vpop.f32.mrb[16].mxu0 }
 0x184   : > { %v700_v57 = vadd.f32 %v653_v56, %v593_v46  ;;  %v655_v58 = vpop.f32.mrb[17].mxu0 }
 0x185   : > { %v701_v59 = vadd.f32 %v655_v58, %v594_v48  ;;  %v657_v60 = vpop.f32.mrb[18].mxu0  ;;  %v801_v61 = vpop.f32.mrb[20].mxu1 }
 0x186   : > { %v658_v62 = vpop.f32.mrb[19].mxu0  ;;  %v809_v63 = vadd.f32 %v801_v61, %v702_v52  ;;  %v1327_v2 = vpop.f32.mrb[21].mxu1 }
 0x187   : > { %v804_v3 = vpop.f32.mrb[22].mxu1 }
 0x188   : > { %v1328_v4 = vpop.f32.mrb[23].mxu1 }
 0x18b   : > { %v760_v5 = vpop.f32.mrb[20].mxu0 }
 0x18c   : > { %v807_v6 = vadd.f32 %v760_v5, %v700_v57  ;;  %v762_v7 = vpop.f32.mrb[21].mxu0 }
 0x18d   : > { %v808_v8 = vadd.f32 %v762_v7, %v701_v59  ;;  %v764_v9 = vpop.f32.mrb[22].mxu0  ;;  %v908_v10 = vpop.f32.mrb[24].mxu1 }
 0x18e   : > { %v765_v11 = vpop.f32.mrb[23].mxu0  ;;  %v916_v12 = vadd.f32 %v908_v10, %v809_v63  ;;  %v1333_v13 = vpop.f32.mrb[25].mxu1 }
 0x18f   : > { %v911_v14 = vpop.f32.mrb[26].mxu1 }
 0x190   : > { %v1334_v15 = vpop.f32.mrb[27].mxu1 }
 0x193   : > { %v867_v0 = vpop.f32.mrb[24].mxu0 }
 0x194   : > { %v914_v16 = vadd.f32 %v867_v0, %v807_v6  ;;  %v869_v17 = vpop.f32.mrb[25].mxu0 }
 0x195   : > { %v915_v18 = vadd.f32 %v869_v17, %v808_v8  ;;  %v871_v19 = vpop.f32.mrb[26].mxu0  ;;  %v1015_v20 = vpop.f32.mrb[28].mxu1 }
 0x196   : > { %v872_v21 = vpop.f32.mrb[27].mxu0  ;;  %v1023_v22 = vadd.f32 %v1015_v20, %v916_v12  ;;  %v1339_v23 = vpop.f32.mrb[29].mxu1 }
 0x197   : > { %v1018_v24 = vpop.f32.mrb[30].mxu1 }
 0x198   : > { %v1340_v25 = vpop.f32.mrb[31].mxu1 }
 0x19b   : > { %v974_v1 = vpop.f32.mrb[28].mxu0 }
 0x19c   : > { %v1021_v26 = vadd.f32 %v974_v1, %v914_v16  ;;  %v976_v27 = vpop.f32.mrb[29].mxu0 }
 0x19d   : > { %v1022_v29 = vadd.f32 %v976_v27, %v915_v18  ;;  %v978_v30 = vpop.f32.mrb[30].mxu0  ;;  %v1122_v31 = vpop.f32.mrb[32].mxu1 }
 0x19e   : > { %v979_v32 = vpop.f32.mrb[31].mxu0  ;;  %v1130_v33 = vadd.f32 %v1122_v31, %v1023_v22  ;;  %v1345_v34 = vpop.f32.mrb[33].mxu1 }
 0x19f   : > { %v1125_v35 = vpop.f32.mrb[34].mxu1 }
 0x1a0   : > { %v1346_v36 = vpop.f32.mrb[35].mxu1  ;;  %v1139_v40 = vadd.f32 %v1135_v28, %v1130_v33 }
 0x1a2   : > { %v1142_v46 = vmax.f32 %v1139_v40, 0.0 }
 0x1a3   : > { %v1081_v41 = vpop.f32.mrb[32].mxu0 }
 0x1a4   : > { %v1128_v42 = vadd.f32 %v1081_v41, %v1021_v26  ;;  %v1083_v43 = vpop.f32.mrb[33].mxu0  ;;  %v1145_v54 = vpack.c.bf16 %v1142_v46, %v1142_v46 }
 0x1a5   : > { %v1129_v47 = vadd.f32 %v1083_v43, %v1022_v29  ;;  %v1085_v48 = vpop.f32.mrb[34].mxu0 }
 0x1a6   : > { %v1137_v49 = vadd.f32 %v1135_v28, %v1128_v42  ;;  %v1086_v50 = vpop.f32.mrb[35].mxu0  ;;  %v1163_v57 = vrot.slane %v1145_v54, %v1155_v53 }
 0x1a7   : > { %v1138_v51 = vadd.f32 %v1135_v28, %v1129_v47 }
 0x1a8   : > { %v1140_v52 = vmax.f32 %v1137_v49, 0.0 }
 0x1a9   : > { %v1141_v55 = vmax.f32 %v1138_v51, 0.0 }
 0x1ab   : > { %v1272_v56 = vpack.c.bf16 %v1141_v55, %v1140_v52 }
 0x1ad   : > { %v1156_v58 = vrot.slane %v1272_v56, %v1155_v53 }
 0x1af   : > { %v1164_v59 = vcombine.low %v1156_v58, %v1163_v57 }
 0x1b1   : > { %1171 = vst.msk [vmem:[%s170_s24] sm:$0x3f] %vm1170_vm15, %v1164_v59 }
 0x1b2 PF: > { %s13_s12 = sadd.s32 1, %s1379_s12  }
 0x1b3   : > { %p10_p4 = scmp.ge.s32.totalorder %s13_s12, 4  }
 0x1b5   :  { %12 = sbr.rel (!%p10_p4) target bundleno = 1 (0x1), region = 70 }

// kernel: up_forward.9
= control target key start
LH: loop header
LB: loop body
LE: loop exit
PB: predicated region body
PF: predicated region fallthrough
CT: control target
= control target key end

     0   :  { %s312_s12 = smov 0   ;;  %s335_s0 = inlined_call_operand.vmem [shape: f32[2,4,288], index: 0, kind: input, shape index: {}]   ;;  %s336_s1 = inlined_call_operand.vmem [shape: f32[4,1], index: 1, kind: input, shape index: {}]   ;;  %s337_s2 = inlined_call_operand.vmem [shape: f32[4,1], index: 2, kind: input, shape index: {}]   ;;  %s338_s3 = inlined_call_operand.vmem [shape: f32[2,4,288], index: 3, kind: output, shape index: {}]  }
   0x1 LB: > { %s261_s13 = sadd.s32 4294967295, %s288_s12   ;;  %p265_p0 = scmp.ge.s32.totalorder %s288_s12, 1  ;;  %s288_s12 = sphi %s312_s12, %s13_s12  }
   0x2   : > { %p137_p1 = scmp.lt.s32.totalorder %s288_s12, 3 }
   0x4   : > { %p138_p2 = pnand %p265_p0, %p137_p1 }
   0x5   : > { %v173_v0 = vld [vmem:[%s336_s1] sm:$0xf] (!%p138_p2)  ;;  %v290_v1 = vmov (!%p138_p2), 0   ;;  %p161_p3 = scmp.lt.s32.totalorder (!%p138_p2), %s261_s13, 1  ;;  %v291_v3 = vmov (!%p138_p2), 839922192   ;;  %v181_v5 = vlaneseq (!%p138_p2) }
   0x6   : > { %141 = sbr.rel (%p138_p2) target bundleno = 144 (0x90), region = 32  ;;  %281 = vset.pattern.permute.xlu0 (!%p138_p2), %v290_v1  ;;  %v188_v2 = vld [vmem:[%s337_s2] sm:$0xf] (!%p138_p2)  ;;  %v179_v4 = vunpack.c.l.s4 (!%p138_p2), %v291_v3  ;;  %vm204_vm0 = vcmask (!%p138_p2), 257024  }
   0x7   : > { %176 = vperm.xlu0 (!%p138_p2), %281, %v173_v0   ;;  %v182_v7 = vshrl.u32 (!%p138_p2), %v181_v5, 7 }
   0x8   : > { %v180_v6 = vunpack.c.0.s8 (!%p138_p2), %v179_v4 }
   0xa   : > { %v183_v8 = vsub.s32 (!%p138_p2), %v180_v6, %v182_v7 }
   0xb   : > { %191 = vperm.xlu0 (!%p138_p2), %281, %v188_v2  }
   0xd   : > { %s340_s13 = smov (!%p161_p3, %s261_s13), 1 }
   0xe   : > { %s270_s18 = smul.u32 12, %s340_s13 }
  0x10   : > { %s165_s21 = scalar_lea.vmem %s335_s0, %s270_s18  ;;  %s170_s24 = scalar_lea.vmem %s338_s3, %s270_s18 }
  0x11   : > { %v171_v11 = vld [vmem:[%s165_s21] sm:$0xff]  ;;  %v172_v12 = vld [vmem:[%s165_s21 + $0x8] sm:$0xf] }
  0x86   : > { %v177_v9 = vpop.permute.xlu0 %176 }
  0x87   : > { %v184_v10 = vrot.slane %v177_v9, %v183_v8 }
  0x89   : > { %v186_v14 = vmul.f32 %v184_v10, %v171_v11  ;;  %v187_v15 = vmul.f32 %v184_v10, %v172_v12 }
  0x8a   : > { %v192_v13 = vpop.permute.xlu0 %191 }
  0x8b   : > { %v199_v16 = vrot.slane %v192_v13, %v183_v8 }
  0x8d   : > { %v201_v17 = vadd.f32 %v199_v16, %v186_v14  ;;  %v202_v18 = vadd.f32 %v199_v16, %v187_v15 }
  0x8f   : > { %203 = vst [vmem:[%s170_s24] sm:$0xff] %v201_v17  ;;  %205 = vst.msk [vmem:[%s170_s24 + $0x8] sm:$0xf] %vm204_vm0, %v202_v18 }
  0x90 PF: > { %s13_s12 = sadd.s32 1, %s288_s12  }
  0x91   : > { %p10_p4 = scmp.ge.s32.totalorder %s13_s12, 4  }
  0x93   :  { %12 = sbr.rel (!%p10_p4) target bundleno = 1 (0x1), region = 62 }

// kernel: up_forward.8
= control target key start
LH: loop header
LB: loop body
LE: loop exit
PB: predicated region body
PF: predicated region fallthrough
CT: control target
= control target key end

     0   :  { %s1633_s18 = smov 0   ;;  %s1810_s0 = inlined_call_operand.vmem [shape: bf16[2,4,326], index: 0, kind: input, shape index: {}]   ;;  %s1811_s1 = inlined_call_operand.vmem [shape: bf16[9,4,4], index: 1, kind: input, shape index: {}]   ;;  %s1812_s2 = inlined_call_operand.vmem [shape: f32[4,1], index: 2, kind: input, shape index: {}]   ;;  %s1813_s3 = inlined_call_operand.vmem [shape: f32[2,4,288], index: 3, kind: output, shape index: {0}]   ;;  %s1814_s4 = inlined_call_operand.vmem [shape: f32[2,4,1], index: 4, kind: output, shape index: {1}]   ;;  %s1815_s5 = inlined_call_operand.vmem [shape: f32[2,4,1], index: 5, kind: output, shape index: {2}]  }
   0x1 LB: > { %s1435_s19 = sadd.s32 4294967295, %s1589_s18   ;;  %p1439_p0 = scmp.ge.s32.totalorder %s1589_s18, 1  ;;  %s1589_s18 = sphi %s1633_s18, %s16_s18  }
   0x2   : > { %p192_p1 = scmp.lt.s32.totalorder %s1589_s18, 3 }
   0x4   : > { %p193_p2 = pnand %p1439_p0, %p192_p1 }
   0x5   : > { %p228_p3 = scmp.lt.s32.totalorder (!%p193_p2), %s1435_s19, 1  ;;  %v256_v0 = vlaneseq (!%p193_p2)  ;;  %v1591_v1 = vmov (!%p193_p2), 1983009808   ;;  %v1592_v3 = vmov (!%p193_p2), 0.0   ;;  %vm1593_vm0 = vmmov (!%p193_p2), 0   ;;  %s1595_s24 = smov (!%p193_p2), 127  }
   0x6   : > { %196 = sbr.rel (%p193_p2) target bundleno = 578 (0x242), region = 32  ;;  %v254_v2 = vunpack.c.l.s4 (!%p193_p2), %v1591_v1  ;;  %1499 = vmatprep.subr.bf16.mxu1 (!%p193_p2), %v1592_v3  ;;  %1501 = vmatprep.mubr.msk.bf16.mxu1 (!%p193_p2), %vm1593_vm0, %v1592_v3  ;;  %v1594_v6 = vmov (!%p193_p2), 0   ;;  %s1596_s25 = smov (!%p193_p2), 126   ;;  %v1214_v13 = vld [vmem:[%s1812_s2] sm:$0xf] (!%p193_p2)  ;;  %vm281_vm1 = vcmask (!%p193_p2), 1041408  }
   0x7   : > { %v257_v4 = vshrl.u32 (!%p193_p2), %v256_v0, 7  ;;  %323 = vmatprep.mubr.bf16.mxu0 (!%p193_p2), %v1594_v6  ;;  %1581 = vset.pattern.permute.xlu0 (!%p193_p2), %v1594_v6  ;;  %s1597_s26 = smov (!%p193_p2), 110   ;;  %s1598_s27 = smov (!%p193_p2), 109   ;;  %vm274_vm2 = vcmask (!%p193_p2), 1039360   ;;  %v1444_v18 = vld [vmem:[%s1811_s1 + $0x2] sm:$0x3] (!%p193_p2) }
   0x8   : > { %v255_v5 = vunpack.c.0.s8 (!%p193_p2), %v254_v2  ;;  %s1599_s28 = smov (!%p193_p2), 108   ;;  %s1600_s29 = smov (!%p193_p2), 92   ;;  %vm277_vm3 = vcmask (!%p193_p2), 31744   ;;  %vm473_vm4 = vcmask (!%p193_p2), 1031168   ;;  %v248_v28 = vld [vmem:[%s1811_s1] sm:$0x3] (!%p193_p2) }
   0x9   : > { %s1601_s30 = smov (!%p193_p2), 91   ;;  %s1602_s6 = smov (!%p193_p2), 90   ;;  %vm580_vm5 = vcmask (!%p193_p2), 900096   ;;  %v1451_v37 = vld [vmem:[%s1811_s1 + $0x4] sm:$0x3] (!%p193_p2)  ;;  %vm687_vm6 = vcmask (!%p193_p2), 891904  }
   0xa   : > { %v258_v7 = vsub.s32 (!%p193_p2), %v255_v5, %v257_v4  ;;  %v1455_v46 = vld [vmem:[%s1811_s1 + $0x6] sm:$0x3] (!%p193_p2)  ;;  %vm794_vm7 = vcmask (!%p193_p2), 883712   ;;  %v1459_v54 = vld [vmem:[%s1811_s1 + $0x8] sm:$0x3] (!%p193_p2)  ;;  %vm901_vm8 = vcmask (!%p193_p2), 752640  }
   0xb   : > { %v1463_v62 = vld [vmem:[%s1811_s1 + $0xa] sm:$0x3] (!%p193_p2)  ;;  %vm1008_vm9 = vcmask (!%p193_p2), 744448   ;;  %vm1115_vm10 = vcmask (!%p193_p2), 736256  }
   0xd   : > { %s1823_s19 = smov (!%p228_p3, %s1435_s19), 1 }
   0xe   : > { %s1553_s20 = smul.u32 6, %s1823_s19  ;;  %s1442_s8 = sshll.u32 %s1823_s19, 2 }
   0xf   : > { %s241_s11 = scalar_lea.vmem %s1814_s4, %s1442_s8  ;;  %s245_s14 = scalar_lea.vmem %s1815_s5, %s1442_s8 }
  0x10   : > { %s232_s23 = scalar_lea.vmem %s1810_s0, %s1553_s20 }
  0x11   : > { %v247_v8 = vld [vmem:[%s232_s23] sm:$0x3f] }
  0x12   : > { %v259_v9 = vrot.slane %v247_v8, %v258_v7  ;;  %v252_v10 = vcombine.high %v247_v8, %v247_v8  ;;  %v1467_v8 = vld [vmem:[%s1811_s1 + $0xc] sm:$0x3] }
  0x14   : > { %268 = vrot.lane.b32.xlu0 %v259_v9, %s1595_s24  ;;  %v266_v11 = vrot.slane %v252_v10, %v258_v7  ;;  %v267_v12 = vcombine.high %v259_v9, %v259_v9  ;;  %v376_v24 = vsel %vm281_vm1, %v259_v9, 0 }
  0x16   : > { %272 = vrot.lane.b32.xlu1 %v266_v11, %s1595_s24  ;;  %v382_v21 = vsel %vm281_vm1, %v266_v11, 0 }
  0x18   : > { %270 = vrot.lane.b32.xlu0 %v267_v12, %s1595_s24 }
  0x1a   : > { %467 = vrot.lane.b32.xlu1 %v259_v9, %s1596_s25 }
  0x1c   : > { %469 = vrot.lane.b32.xlu0 %v267_v12, %s1596_s25 }
  0x1e   : > { %471 = vrot.lane.b32.xlu1 %v266_v11, %s1596_s25 }
  0x20   : > { %574 = vrot.lane.b32.xlu0 %v259_v9, %s1597_s26 }
  0x22   : > { %576 = vrot.lane.b32.xlu1 %v267_v12, %s1597_s26 }
  0x24   : > { %578 = vrot.lane.b32.xlu0 %v266_v11, %s1597_s26 }
  0x26   : > { %681 = vrot.lane.b32.xlu1 %v259_v9, %s1598_s27 }
  0x28   : > { %683 = vrot.lane.b32.xlu0 %v267_v12, %s1598_s27 }
  0x2a   : > { %685 = vrot.lane.b32.xlu1 %v266_v11, %s1598_s27 }
  0x2c   : > { %788 = vrot.lane.b32.xlu0 %v259_v9, %s1599_s28 }
  0x2e   : > { %790 = vrot.lane.b32.xlu1 %v267_v12, %s1599_s28 }
  0x30   : > { %792 = vrot.lane.b32.xlu0 %v266_v11, %s1599_s28 }
  0x32   : > { %895 = vrot.lane.b32.xlu1 %v259_v9, %s1600_s29 }
  0x34   : > { %897 = vrot.lane.b32.xlu0 %v267_v12, %s1600_s29 }
  0x36   : > { %899 = vrot.lane.b32.xlu1 %v266_v11, %s1600_s29  ;;  %s1554_s29 = smul.u32 12, %s1823_s19 }
  0x38   : > { %1002 = vrot.lane.b32.xlu0 %v259_v9, %s1601_s30  ;;  %s237_s7 = scalar_lea.vmem %s1813_s3, %s1554_s29 }
  0x3a   : > { %1004 = vrot.lane.b32.xlu1 %v267_v12, %s1601_s30 }
  0x3c   : > { %1006 = vrot.lane.b32.xlu0 %v266_v11, %s1601_s30 }
  0x3e   : > { %1109 = vrot.lane.b32.xlu1 %v259_v9, %s1602_s6 }
  0x40   : > { %1111 = vrot.lane.b32.xlu0 %v267_v12, %s1602_s6 }
  0x42   : > { %1113 = vrot.lane.b32.xlu1 %v266_v11, %s1602_s6 }
  0x44   : > { %1217 = vperm.xlu0 %1581, %v1214_v13  }
  0x86   : > { %v269_v14 = vpop.permute.xlu0 %268 }
  0x88   : > { %v273_v15 = vpop.permute.xlu1 %272 }
  0x89   : > { %v289_v16 = vsel %vm281_vm1, %v273_v15, 0 }
  0x8a   : > { %v271_v17 = vpop.permute.xlu0 %270  ;;  %1500 = vmatpush3.bf16.msra.mxu1 %v289_v16 }
  0x8b   : > { %v276_v19 = vsel %vm274_vm2, %v271_v17, %v273_v15  ;;  %v275_v20 = vsel %vm274_vm2, %v269_v14, %v271_v17  ;;  %1505 = vmatprep.subr.bf16.mxu1 %v1592_v3  ;;  %v1471_v15 = vld [vmem:[%s1811_s1 + $0xe] sm:$0x3] }
  0x8c   : > { %1445 = vmatprep.subr.msk.bf16.mxu0 %vm281_vm1, %v276_v19  ;;  %v283_v22 = vsel %vm281_vm1, %v275_v20, 0  ;;  %v468_v23 = vpop.permute.xlu1 %467  ;;  %v1475_v19 = vld [vmem:[%s1811_s1 + $0x10] sm:$0x3] }
  0x8d   : > { %292 = vmatpush1.bf16.msra.mxu0 %v283_v22  ;;  %1502 = vmatmul.mubr.msk.bf16.vlgmr.msra.gmra.mrb[0].mxu1 %vm277_vm3, %v1444_v18 }
  0x8e   : > { %1448 = vmatprep.subr.msk.bf16.mxu0 %vm281_vm1, %v267_v12  ;;  %v470_v25 = vpop.permute.xlu0 %469  ;;  %1506 = vmatpush3.bf16.msra.mxu1 %v382_v21 }
  0x8f   : > { %1507 = vmatprep.mubr.msk.bf16.mxu1 %vm1593_vm0, %v1592_v3  ;;  %1511 = vmatprep.subr.bf16.mxu1 %v1592_v3  ;;  %v474_v30 = vsel %vm473_vm4, %v468_v23, %v470_v25 }
  0x90   : > { %1446 = vmatmul.mubr.msk.bf16.vlgmr.msra.gmra.mrb[0].mxu0 %vm277_vm3, %v1444_v18  ;;  %v472_v26 = vpop.permute.xlu1 %471  ;;  %v480_v33 = vsel %vm281_vm1, %v474_v30, 0 }
  0x91   : > { %385 = vmatpush1.bf16.msra.mxu0 %v376_v24  ;;  %v475_v27 = vsel %vm473_vm4, %v470_v25, %v472_v26  ;;  %416 = vmatprep.mubr.bf16.mxu0 %v1594_v6  ;;  %v486_v31 = vsel %vm281_vm1, %v472_v26, 0  ;;  %vm1231_vm4 = vcmask 257024  }
  0x92   : > { %1452 = vmatprep.subr.msk.bf16.mxu0 %vm281_vm1, %v475_v27  ;;  %v575_v29 = vpop.permute.xlu0 %574 }
  0x94   : > { %v577_v32 = vpop.permute.xlu1 %576 }
  0x95   : > { %1508 = vmatmul.mubr.msk.bf16.vlgmr.msra.gmra.mrb[4].mxu1 %vm277_vm3, %v248_v28  ;;  %v581_v39 = vsel %vm580_vm5, %v575_v29, %v577_v32 }
  0x96   : > { %1512 = vmatpush3.bf16.msra.mxu1 %v486_v31  ;;  %1513 = vmatprep.mubr.msk.bf16.mxu1 %vm1593_vm0, %v1592_v3  ;;  %v579_v34 = vpop.permute.xlu0 %578  ;;  %v587_v42 = vsel %vm281_vm1, %v581_v39, 0 }
  0x97   : > { %v582_v35 = vsel %vm580_vm5, %v577_v32, %v579_v34  ;;  %1517 = vmatprep.subr.bf16.mxu1 %v1592_v3  ;;  %v593_v40 = vsel %vm281_vm1, %v579_v34, 0 }
  0x98   : > { %1449 = vmatmul.mubr.msk.bf16.vlgmr.msra.gmra.mrb[4].mxu0 %vm277_vm3, %v248_v28  ;;  %v682_v36 = vpop.permute.xlu1 %681 }
  0x99   : > { %489 = vmatpush1.bf16.msra.mxu0 %v480_v33  ;;  %520 = vmatprep.mubr.bf16.mxu0 %v1594_v6 }
  0x9a   : > { %1456 = vmatprep.subr.msk.bf16.mxu0 %vm281_vm1, %v582_v35  ;;  %v684_v38 = vpop.permute.xlu0 %683 }
  0x9b   : > { %v688_v47 = vsel %vm687_vm6, %v682_v36, %v684_v38 }
  0x9c   : > { %v686_v41 = vpop.permute.xlu1 %685  ;;  %v694_v50 = vsel %vm281_vm1, %v688_v47, 0 }
  0x9d   : > { %1514 = vmatmul.mubr.msk.bf16.vlgmr.msra.gmra.mrb[8].mxu1 %vm277_vm3, %v1451_v37  ;;  %v689_v44 = vsel %vm687_vm6, %v684_v38, %v686_v41  ;;  %v700_v48 = vsel %vm281_vm1, %v686_v41, 0 }
  0x9e   : > { %1518 = vmatpush3.bf16.msra.mxu1 %v593_v40  ;;  %1519 = vmatprep.mubr.msk.bf16.mxu1 %vm1593_vm0, %v1592_v3  ;;  %v789_v43 = vpop.permute.xlu0 %788 }
  0x9f   : > { %1523 = vmatprep.subr.bf16.mxu1 %v1592_v3 }
  0xa0   : > { %1453 = vmatmul.mubr.msk.bf16.vlgmr.msra.gmra.mrb[8].mxu0 %vm277_vm3, %v1451_v37  ;;  %v791_v45 = vpop.permute.xlu1 %790 }
  0xa1   : > { %596 = vmatpush1.bf16.msra.mxu0 %v587_v42  ;;  %627 = vmatprep.mubr.bf16.mxu0 %v1594_v6  ;;  %v795_v55 = vsel %vm794_vm7, %v789_v43, %v791_v45 }
  0xa2   : > { %1460 = vmatprep.subr.msk.bf16.mxu0 %vm281_vm1, %v689_v44  ;;  %v793_v49 = vpop.permute.xlu0 %792  ;;  %v801_v58 = vsel %vm281_vm1, %v795_v55, 0 }
  0xa3   : > { %v796_v52 = vsel %vm794_vm7, %v791_v45, %v793_v49  ;;  %v807_v56 = vsel %vm281_vm1, %v793_v49, 0 }
  0xa4   : > { %v896_v51 = vpop.permute.xlu1 %895 }
  0xa5   : > { %1520 = vmatmul.mubr.msk.bf16.vlgmr.msra.gmra.mrb[12].mxu1 %vm277_vm3, %v1455_v46 }
  0xa6   : > { %1524 = vmatpush3.bf16.msra.mxu1 %v700_v48  ;;  %1525 = vmatprep.mubr.msk.bf16.mxu1 %vm1593_vm0, %v1592_v3  ;;  %v898_v53 = vpop.permute.xlu0 %897 }
  0xa7   : > { %1529 = vmatprep.subr.bf16.mxu1 %v1592_v3  ;;  %v902_v63 = vsel %vm901_vm8, %v896_v51, %v898_v53 }
  0xa8   : > { %1457 = vmatmul.mubr.msk.bf16.vlgmr.msra.gmra.mrb[12].mxu0 %vm277_vm3, %v1455_v46  ;;  %v900_v57 = vpop.permute.xlu1 %899  ;;  %v908_v4 = vsel %vm281_vm1, %v902_v63, 0 }
  0xa9   : > { %703 = vmatpush1.bf16.msra.mxu0 %v694_v50  ;;  %734 = vmatprep.mubr.bf16.mxu0 %v1594_v6  ;;  %v903_v60 = vsel %vm901_vm8, %v898_v53, %v900_v57  ;;  %v914_v1 = vsel %vm281_vm1, %v900_v57, 0  ;;  %vm1297_vm8 = vcmask 1043456  }
  0xaa   : > { %1464 = vmatprep.subr.msk.bf16.mxu0 %vm281_vm1, %v796_v52  ;;  %v1003_v59 = vpop.permute.xlu0 %1002 }
  0xac   : > { %v1005_v61 = vpop.permute.xlu1 %1004 }
  0xad   : > { %1526 = vmatmul.mubr.msk.bf16.vlgmr.msra.gmra.mrb[16].mxu1 %vm277_vm3, %v1459_v54  ;;  %v1009_v9 = vsel %vm1008_vm9, %v1003_v59, %v1005_v61 }
  0xae   : > { %1530 = vmatpush3.bf16.msra.mxu1 %v807_v56  ;;  %1531 = vmatprep.mubr.msk.bf16.mxu1 %vm1593_vm0, %v1592_v3  ;;  %v1007_v2 = vpop.permute.xlu0 %1006  ;;  %v1015_v13 = vsel %vm281_vm1, %v1009_v9, 0 }
  0xaf   : > { %1535 = vmatprep.subr.bf16.mxu1 %v1592_v3  ;;  %v1010_v7 = vsel %vm1008_vm9, %v1005_v61, %v1007_v2  ;;  %v1021_v10 = vsel %vm281_vm1, %v1007_v2, 0  ;;  %vm1305_vm9 = vcmask 3072  }
  0xb0   : > { %1461 = vmatmul.mubr.msk.bf16.vlgmr.msra.gmra.mrb[16].mxu0 %vm277_vm3, %v1459_v54  ;;  %v1110_v5 = vpop.permute.xlu1 %1109 }
  0xb1   : > { %810 = vmatpush1.bf16.msra.mxu0 %v801_v58  ;;  %841 = vmatprep.mubr.bf16.mxu0 %v1594_v6 }
  0xb2   : > { %1468 = vmatprep.subr.msk.bf16.mxu0 %vm281_vm1, %v903_v60  ;;  %v1112_v11 = vpop.permute.xlu0 %1111 }
  0xb3   : > { %v1116_v16 = vsel %vm1115_vm10, %v1110_v5, %v1112_v11 }
  0xb4   : > { %v1114_v12 = vpop.permute.xlu1 %1113  ;;  %v1122_v18 = vsel %vm281_vm1, %v1116_v16, 0 }
  0xb5   : > { %1532 = vmatmul.mubr.msk.bf16.vlgmr.msra.gmra.mrb[20].mxu1 %vm277_vm3, %v1463_v62  ;;  %v1117_v14 = vsel %vm1115_vm10, %v1112_v11, %v1114_v12  ;;  %v1128_v17 = vsel %vm281_vm1, %v1114_v12, 0 }
  0xb6   : > { %1536 = vmatpush3.bf16.msra.mxu1 %v914_v1  ;;  %1537 = vmatprep.mubr.msk.bf16.mxu1 %vm1593_vm0, %v1592_v3 }
  0xb7   : > { %1541 = vmatprep.subr.bf16.mxu1 %v1592_v3 }
  0xb8   : > { %1465 = vmatmul.mubr.msk.bf16.vlgmr.msra.gmra.mrb[20].mxu0 %vm277_vm3, %v1463_v62  ;;  %v1234_v62 = vand.u32 127, %v256_v0 }
  0xb9   : > { %917 = vmatpush1.bf16.msra.mxu0 %v908_v4  ;;  %948 = vmatprep.mubr.bf16.mxu0 %v1594_v6 }
  0xba   : > { %1472 = vmatprep.subr.msk.bf16.mxu0 %vm281_vm1, %v1010_v7  ;;  %v1236_v9 = vadd.s32 256, %v1234_v62  ;;  %v1235_v11 = vadd.s32 128, %v1234_v62 }
  0xbd   : > { %1538 = vmatmul.mubr.msk.bf16.vlgmr.msra.gmra.mrb[24].mxu1 %vm277_vm3, %v1467_v8 }
  0xbe   : > { %1542 = vmatpush3.bf16.msra.mxu1 %v1021_v10  ;;  %1543 = vmatprep.mubr.msk.bf16.mxu1 %vm1593_vm0, %v1592_v3 }
  0xbf   : > { %1547 = vmatprep.subr.bf16.mxu1 %v1592_v3 }
  0xc0   : > { %1469 = vmatmul.mubr.msk.bf16.vlgmr.msra.gmra.mrb[24].mxu0 %vm277_vm3, %v1467_v8 }
  0xc1   : > { %1024 = vmatpush1.bf16.msra.mxu0 %v1015_v13  ;;  %1055 = vmatprep.mubr.bf16.mxu0 %v1594_v6 }
  0xc2   : > { %1476 = vmatprep.subr.msk.bf16.mxu0 %vm281_vm1, %v1117_v14 }
  0xc5   : > { %1544 = vmatmul.mubr.msk.bf16.vlgmr.msra.gmra.mrb[28].mxu1 %vm277_vm3, %v1471_v15 }
  0xc6   : > { %1548 = vmatpush3.bf16.msra.mxu1 %v1128_v17  ;;  %1549 = vmatprep.mubr.msk.bf16.mxu1 %vm1593_vm0, %v1592_v3 }
  0xc8   : > { %1473 = vmatmul.mubr.msk.bf16.vlgmr.msra.gmra.mrb[28].mxu0 %vm277_vm3, %v1471_v15  ;;  %v1763_v15 = vmul.u32.u64.low 3817748708, %v1236_v9  ;;  %v1764_v16 = vmul.u32.u64.high 3817748708, %v1236_v9, %v1763_v15 }
  0xc9   : > { %1131 = vmatpush1.bf16.msra.mxu0 %v1122_v18  ;;  %1162 = vmatprep.mubr.bf16.mxu0 %v1594_v6 }
  0xcd   : > { %1550 = vmatmul.mubr.msk.bf16.vlgmr.msra.gmra.mrb[32].mxu1 %vm277_vm3, %v1475_v19 }
  0xd0   : > { %1477 = vmatmul.mubr.msk.bf16.vlgmr.msra.gmra.mrb[32].mxu0 %vm277_vm3, %v1475_v19  ;;  %v1766_v18 = vmul.u32.u64.low 3817748708, %v1234_v62  ;;  %v1767_v19 = vmul.u32.u64.high 3817748708, %v1234_v62, %v1766_v18 }
 0x160   : > { %v366_v20 = vpop.f32.mrb[0].mxu1 }
 0x161   : > { %v1503_v21 = vpop.f32.mrb[1].mxu1 }
 0x162   : > { %v369_v22 = vpop.f32.mrb[2].mxu1 }
 0x163   : > { %v325_v23 = vpop.f32.mrb[0].mxu0  ;;  %v1504_v24 = vpop.f32.mrb[3].mxu1  ;;  %v1769_v21 = vmul.u32.u64.low 3817748708, %v1235_v11  ;;  %v1770_v22 = vmul.u32.u64.high 3817748708, %v1235_v11, %v1769_v21 }
 0x164   : > { %v327_v25 = vpop.f32.mrb[1].mxu0 }
 0x165   : > { %v329_v3 = vpop.f32.mrb[2].mxu0 }
 0x166   : > { %v330_v26 = vpop.f32.mrb[3].mxu0 }
 0x168   : > { %v459_v27 = vpop.f32.mrb[4].mxu1 }
 0x169   : > { %v460_v28 = vadd.f32 %v459_v27, %v366_v20  ;;  %v1509_v29 = vpop.f32.mrb[5].mxu1 }
 0x16a   : > { %v462_v6 = vpop.f32.mrb[6].mxu1 }
 0x16b   : > { %v418_v30 = vpop.f32.mrb[4].mxu0  ;;  %v1510_v31 = vpop.f32.mrb[7].mxu1  ;;  %v1265_v6 = vshrl.u32 %v1764_v16, 4 }
 0x16c   : > { %v419_v32 = vadd.f32 %v418_v30, %v325_v23  ;;  %v420_v33 = vpop.f32.mrb[5].mxu0  ;;  %v1243_v31 = vshrl.u32 %v1767_v19, 4 }
 0x16d   : > { %v421_v34 = vadd.f32 %v420_v33, %v327_v25  ;;  %v422_v35 = vpop.f32.mrb[6].mxu0 }
 0x16e   : > { %v423_v36 = vpop.f32.mrb[7].mxu0 }
 0x170   : > { %v563_v37 = vpop.f32.mrb[8].mxu1 }
 0x171   : > { %v571_v38 = vadd.f32 %v563_v37, %v460_v28  ;;  %v1515_v39 = vpop.f32.mrb[9].mxu1 }
 0x172   : > { %v566_v40 = vpop.f32.mrb[10].mxu1  ;;  %v1266_v39 = vmul.u32 18, %v1265_v6 }
 0x173   : > { %v522_v41 = vpop.f32.mrb[8].mxu0  ;;  %v1516_v42 = vpop.f32.mrb[11].mxu1 }
 0x174   : > { %v569_v43 = vadd.f32 %v522_v41, %v419_v32  ;;  %v524_v44 = vpop.f32.mrb[9].mxu0  ;;  %v1244_v41 = vmul.u32 18, %v1243_v31 }
 0x175   : > { %v570_v45 = vadd.f32 %v524_v44, %v421_v34  ;;  %v526_v46 = vpop.f32.mrb[10].mxu0  ;;  %v1254_v34 = vshrl.u32 %v1770_v22, 4 }
 0x176   : > { %v527_v47 = vpop.f32.mrb[11].mxu0  ;;  %v1267_v46 = vsub.s32 %v1236_v9, %v1266_v39 }
 0x177   : > { %v1255_v42 = vmul.u32 18, %v1254_v34 }
 0x178   : > { %v670_v48 = vpop.f32.mrb[12].mxu1  ;;  %vm1272_vm11 = vcmp.ne.s32.totalorder %v1267_v46, 0  ;;  %vm1275_vm12 = vcmp.lt.s32.totalorder %v1267_v46, 0 }
 0x179   : > { %v678_v49 = vadd.f32 %v670_v48, %v571_v38  ;;  %v1521_v50 = vpop.f32.mrb[13].mxu1  ;;  %v1245_v48 = vsub.s32 %v1234_v62, %v1244_v41  ;;  %vm1776_vm1 = vmand %vm1275_vm12, %vm1272_vm11 }
 0x17a   : > { %v673_v51 = vpop.f32.mrb[14].mxu1 }
 0x17b   : > { %v629_v52 = vpop.f32.mrb[12].mxu0  ;;  %v1522_v53 = vpop.f32.mrb[15].mxu1  ;;  %v1256_v51 = vsub.s32 %v1235_v11, %v1255_v42  ;;  %vm1270_vm13 = vcmp.ne.s32.totalorder %v1245_v48, 0  ;;  %vm1273_vm14 = vcmp.lt.s32.totalorder %v1245_v48, 0 }
 0x17c   : > { %v676_v54 = vadd.f32 %v629_v52, %v569_v43  ;;  %v631_v55 = vpop.f32.mrb[13].mxu0  ;;  %vm1780_vm2 = vmand %vm1273_vm14, %vm1270_vm13 }
 0x17d   : > { %v677_v56 = vadd.f32 %v631_v55, %v570_v45  ;;  %v633_v57 = vpop.f32.mrb[14].mxu0  ;;  %vm1271_vm15 = vcmp.ne.s32.totalorder %v1256_v51, 0  ;;  %vm1274_vm0 = vcmp.lt.s32.totalorder %v1256_v51, 0 }
 0x17e   : > { %v634_v58 = vpop.f32.mrb[15].mxu0  ;;  %v1281_v57 = vadd.s32 18, %v1267_v46  ;;  %vm1784_vm3 = vmand %vm1274_vm0, %vm1271_vm15 }
 0x180   : > { %v777_v59 = vpop.f32.mrb[16].mxu1 }
 0x181   : > { %v785_v60 = vadd.f32 %v777_v59, %v678_v49  ;;  %v1527_v61 = vpop.f32.mrb[17].mxu1  ;;  %v1218_v59 = vpop.permute.xlu0 %1217 }
 0x182   : > { %v780_v63 = vpop.f32.mrb[18].mxu1 }
 0x183   : > { %v736_v1 = vpop.f32.mrb[16].mxu0  ;;  %v1528_v2 = vpop.f32.mrb[19].mxu1 }
 0x184   : > { %v783_v4 = vadd.f32 %v736_v1, %v676_v54  ;;  %v738_v5 = vpop.f32.mrb[17].mxu0  ;;  %v1280_v1 = vadd.s32 18, %v1256_v51 }
 0x185   : > { %v784_v7 = vadd.f32 %v738_v5, %v677_v56  ;;  %v740_v8 = vpop.f32.mrb[18].mxu0 }
 0x186   : > { %v741_v10 = vpop.f32.mrb[19].mxu0  ;;  %v1283_v16 = vsel %vm1784_vm3, %v1280_v1, %v1256_v51 }
 0x187   : > { %v1284_v10 = vsel %vm1776_vm1, %v1281_v57, %v1267_v46  ;;  %vm1286_vm7 = vcmp.lt.s32.totalorder %v1283_v16, 16 }
 0x188   : > { %v884_v12 = vpop.f32.mrb[20].mxu1  ;;  %vm1287_vm5 = vcmp.lt.s32.totalorder %v1284_v10, 16 }
 0x189   : > { %v892_v13 = vadd.f32 %v884_v12, %v785_v60  ;;  %v1533_v14 = vpop.f32.mrb[21].mxu1  ;;  %v1279_v60 = vadd.s32 18, %v1245_v48 }
 0x18a   : > { %v887_v17 = vpop.f32.mrb[22].mxu1 }
 0x18b   : > { %v843_v0 = vpop.f32.mrb[20].mxu0  ;;  %v1534_v20 = vpop.f32.mrb[23].mxu1  ;;  %v1282_v12 = vsel %vm1780_vm2, %v1279_v60, %v1245_v48 }
 0x18c   : > { %v890_v23 = vadd.f32 %v843_v0, %v783_v4  ;;  %v845_v24 = vpop.f32.mrb[21].mxu0  ;;  %vm1285_vm6 = vcmp.lt.s32.totalorder %v1282_v12, 16 }
 0x18d   : > { %v891_v25 = vadd.f32 %v845_v24, %v784_v7  ;;  %v847_v3 = vpop.f32.mrb[22].mxu0 }
 0x18e   : > { %v848_v26 = vpop.f32.mrb[23].mxu0 }
 0x190   : > { %v991_v27 = vpop.f32.mrb[24].mxu1 }
 0x191   : > { %v999_v28 = vadd.f32 %v991_v27, %v892_v13  ;;  %v1539_v29 = vpop.f32.mrb[25].mxu1 }
 0x192   : > { %v994_v30 = vpop.f32.mrb[26].mxu1 }
 0x193   : > { %v950_v32 = vpop.f32.mrb[24].mxu0  ;;  %v1540_v33 = vpop.f32.mrb[27].mxu1 }
 0x194   : > { %v997_v35 = vadd.f32 %v950_v32, %v890_v23  ;;  %v952_v36 = vpop.f32.mrb[25].mxu0 }
 0x195   : > { %v998_v37 = vadd.f32 %v952_v36, %v891_v25  ;;  %v954_v38 = vpop.f32.mrb[26].mxu0 }
 0x196   : > { %v955_v40 = vpop.f32.mrb[27].mxu0 }
 0x198   : > { %v1098_v43 = vpop.f32.mrb[28].mxu1 }
 0x199   : > { %v1106_v44 = vadd.f32 %v1098_v43, %v999_v28  ;;  %v1545_v45 = vpop.f32.mrb[29].mxu1 }
 0x19a   : > { %v1101_v47 = vpop.f32.mrb[30].mxu1 }
 0x19b   : > { %v1057_v49 = vpop.f32.mrb[28].mxu0  ;;  %v1546_v50 = vpop.f32.mrb[31].mxu1 }
 0x19c   : > { %v1104_v52 = vadd.f32 %v1057_v49, %v997_v35  ;;  %v1059_v53 = vpop.f32.mrb[29].mxu0 }
 0x19d   : > { %v1105_v54 = vadd.f32 %v1059_v53, %v998_v37  ;;  %v1061_v55 = vpop.f32.mrb[30].mxu0 }
 0x19e   : > { %v1062_v56 = vpop.f32.mrb[31].mxu0 }
 0x1a0   : > { %v1205_v58 = vpop.f32.mrb[32].mxu1 }
 0x1a1   : > { %v1213_v62 = vadd.f32 %v1205_v58, %v1106_v44  ;;  %v1551_v2 = vpop.f32.mrb[33].mxu1 }
 0x1a2   : > { %v1208_v5 = vpop.f32.mrb[34].mxu1 }
 0x1a3   : > { %v1222_v7 = vadd.f32 %v1218_v59, %v1213_v62  ;;  %v1164_v8 = vpop.f32.mrb[32].mxu0  ;;  %v1552_v9 = vpop.f32.mrb[35].mxu1 }
 0x1a4   : > { %v1211_v11 = vadd.f32 %v1164_v8, %v1104_v52  ;;  %v1166_v13 = vpop.f32.mrb[33].mxu0 }
 0x1a5   : > { %v1225_v14 = vmax.f32 %v1222_v7, 0.0  ;;  %v1212_v15 = vadd.f32 %v1166_v13, %v1105_v54  ;;  %v1168_v17 = vpop.f32.mrb[34].mxu0 }
 0x1a6   : > { %v1220_v18 = vadd.f32 %v1218_v59, %v1211_v11  ;;  %v1169_v19 = vpop.f32.mrb[35].mxu0 }
 0x1a7   : > { %v1221_v0 = vadd.f32 %v1218_v59, %v1212_v15  ;;  %1232 = vst.msk [vmem:[%s237_s7 + $0x8] sm:$0xf] %vm1231_vm4, %v1225_v14  ;;  %v1296_v22 = vsel %vm1287_vm5, %v1225_v14, 0.0 }
 0x1a8   : > { %v1223_v20 = vmax.f32 %v1220_v18, 0.0  ;;  %v1309_v29 = vmul.f32 %v1296_v22, %v1296_v22  ;;  %v1301_v31 = vsel %vm1231_vm4, %v1296_v22, 0.0 }
 0x1a9   : > { %v1224_v21 = vmax.f32 %v1221_v0, 0.0 }
 0x1aa   : > { %v1294_v23 = vsel %vm1285_vm6, %v1223_v20, 0.0  ;;  %v1313_v35 = vsel %vm1231_vm4, %v1309_v29, 0.0 }
 0x1ab   : > { %v1307_v24 = vmul.f32 %v1294_v23, %v1294_v23  ;;  %v1228_v25 = vcombine.low %v1223_v20, %v1224_v21  ;;  %v1295_v3 = vsel %vm1286_vm7, %v1224_v21, 0.0  ;;  %v1298_v26 = vsel %vm1297_vm8, %v1294_v23, 0.0 }
 0x1ac   : > { %v1308_v27 = vmul.f32 %v1295_v3, %v1295_v3  ;;  %v1299_v28 = vsel %vm1297_vm8, %v1295_v3, 0.0 }
 0x1ad   : > { %1230 = vst [vmem:[%s237_s7] sm:$0xff] %v1228_v25  ;;  %v1300_v6 = vadd.f32 %v1299_v28, %v1298_v26  ;;  %v1310_v30 = vsel %vm1297_vm8, %v1307_v24, 0.0 }
 0x1ae   : > { %v1311_v32 = vsel %vm1297_vm8, %v1308_v27, 0.0 }
 0x1af   : > { %v1302_v33 = vadd.f32 %v1301_v31, %v1300_v6  ;;  %v1312_v34 = vadd.f32 %v1311_v32, %v1310_v30 }
 0x1b1   : > { %1303 = vadd.xlane.f32.xlu1 %v1302_v33  ;;  %v1314_v36 = vadd.f32 %v1313_v35, %v1312_v34 }
 0x1b3   : > { %1315 = vadd.xlane.f32.xlu0 %v1314_v36 }
 0x23e   : > { %v1304_v37 = vpop.xlane.xlu1 %1303 }
 0x23f   : > { %1306 = vst.msk [vmem:[%s241_s11] sm:$0xf] %vm1305_vm9, %v1304_v37 }
 0x240   : > { %v1316_v38 = vpop.xlane.xlu0 %1315 }
 0x241   : > { %1317 = vst.msk [vmem:[%s245_s14] sm:$0xf] %vm1305_vm9, %v1316_v38 }
 0x242 PF: > { %s16_s18 = sadd.s32 1, %s1589_s18  }
 0x243   : > { %p13_p4 = scmp.ge.s32.totalorder %s16_s18, 4  }
 0x245   :  { %15 = sbr.rel (!%p13_p4) target bundleno = 1 (0x1), region = 94 }

</bundles_post_ra>
